<compile_context>
chip_gen: v7x
topology: tpu7x:2x2x1
jax: 0.10.0
libtpu: 0.0.40
codegen_flags: <defaults>
</compile_context>

<pallas_src>
import jax
import jax.numpy as jnp
from jax import lax
from jax.experimental import pallas as pl
from jax.experimental.pallas import tpu as pltpu  # noqa: F401  (kept for TPU-specific params if needed)

# Model / problem sizes (small, consistent with the module's __init__)
B, S = 2, 8            # batch, decoder sequence length
H = 32                 # hidden_size == embedding_dim
I = 64                 # intermediate_size (GRU hidden)
LMAX = 16              # max_seq_len == encoder length (attention width)
V = 128                # num_embeddings (vocab)
NUM_LAYERS = 1         # num_hidden_layers


# ------------------------------------------------------------------ fused kernel

def gru_decoder_kernel(tok_ref, embw_ref, ench_ref,
                       wp_ref, bp_ref,
                       wa_e_ref, wa_h_ref, ba_ref,
                       enc_ref, wc_e_ref, wc_c_ref, bc_ref,
                       wih_ref, bih_ref, whh_ref, bhh_ref,
                       wout_ref, bout_ref,
                       o_ref):
    f32 = jnp.float32

    # ---- word embedding lookup as a one-hot MXU matmul (no standalone XLA gather) ----
    tok = tok_ref[...]                                                  # (B*S, 1) int32
    lane_ids = lax.broadcasted_iota(jnp.int32, (B * S, V), 1)
    onehot = (lane_ids == tok).astype(f32)                              # (B*S, V)
    emb = jnp.dot(onehot, embw_ref[...], preferred_element_type=f32)    # (B*S, H), row = b*S + s

    # ---- hidden_proj: h0 = encoder_hidden[0] @ Wp^T + bp ----
    h = jnp.dot(ench_ref[0], wp_ref[...], preferred_element_type=f32) + bp_ref[...]     # (B, I)

    # ---- attention (concat-free) ----
    # logits = [emb, h_rep] @ Wa^T + ba == emb @ Wa_e + (h @ Wa_h + ba)
    h_logits = jnp.dot(h, wa_h_ref[...], preferred_element_type=f32) + ba_ref[...]      # (B, LMAX)
    logits = (jnp.dot(emb, wa_e_ref[...], preferred_element_type=f32).reshape(B, S, LMAX)
              + h_logits[:, None, :])                                                    # (B, S, LMAX)
    logits = logits - jnp.max(logits, axis=-1, keepdims=True)
    p = jnp.exp(logits)
    score = p / jnp.sum(p, axis=-1, keepdims=True)                      # softmax(dim=2), exact division

    # ctx[b] = score[b] @ encoder_out[b] -- batched einsum, no in-kernel concatenate
    ctx = jnp.einsum("bsl,blh->bsh", score, enc_ref[...],
                     preferred_element_type=f32)                        # (B, S, H)
    ctx_flat = ctx.reshape(B * S, H)                                    # (B*S, H)

    # attn_combine: [emb, ctx] @ Wc^T + bc == emb @ Wc_e + ctx @ Wc_c + bc
    gru_in = (jnp.dot(emb, wc_e_ref[...], preferred_element_type=f32)
              + jnp.dot(ctx_flat, wc_c_ref[...], preferred_element_type=f32)
              + bc_ref[...])                                            # (B*S, H)

    # ---- GRU ----
    # Fused input-to-hidden gates: ONE (B*S, H)@(H, 3I) matmul, gate order [r | z | n].
    gi = (jnp.dot(gru_in, wih_ref[...], preferred_element_type=f32)
          + bih_ref[...]).reshape(B, S, 3 * I)                          # (B, S, 3I)

    # Hoist loop-invariant loads out of the unrolled recurrence.
    whh = whh_ref[...]                                                  # (I, 3I) fused [r|z|n]
    bhh = bhh_ref[...]                                                  # (1, 3I)

    # Serial recurrence, fully unrolled (S small & static): ONE h-dependent matmul
    # + elementwise gates per step on the critical path. No stores inside the loop.
    hs = []
    for t in range(S):
        gh = jnp.dot(h, whh, preferred_element_type=f32) + bhh          # (B, 3I)
        gi_t = gi[:, t, :]                                              # (B, 3I), static slice
        r = jax.nn.sigmoid(gi_t[:, 0 * I:1 * I] + gh[:, 0 * I:1 * I])
        z = jax.nn.sigmoid(gi_t[:, 1 * I:2 * I] + gh[:, 1 * I:2 * I])
        n = jnp.tanh(gi_t[:, 2 * I:3 * I] + r * gh[:, 2 * I:3 * I])
        h = (1.0 - z) * n + z * h                                       # (B, I)
        hs.append(h)

    # Output projection hoisted out of the recurrence: single lane-dense
    # (B*S, I)@(I, V) matmul + ONE unmasked full-tile store.
    h_all = jnp.stack(hs, axis=1).reshape(B * S, I)                     # (B*S, I), row = b*S + s
    y = jnp.dot(h_all, wout_ref[...], preferred_element_type=f32) + bout_ref[...]   # (B*S, V)
    o_ref[...] = y.reshape(B, S, V)


# ------------------------------------------------------------------ wrapper

@jax.jit
def gru_decoder_forward(params, prev_output_tokens, encoder_out, encoder_hidden):
    tok = prev_output_tokens.reshape(B * S, 1).astype(jnp.int32)   # bitcast-level reshape
    return pl.pallas_call(
        gru_decoder_kernel,
        out_shape=jax.ShapeDtypeStruct((B, S, V), jnp.float32),
    )(tok, params["emb_w"], encoder_hidden,
      params["wp_t"], params["bp"],
      params["wa_e_t"], params["wa_h_t"], params["ba"],
      encoder_out, params["wc_e_t"], params["wc_c_t"], params["bc"],
      params["wih_t"], params["bih"], params["whh_t"], params["bhh"],
      params["w_out"], params["b_out"])


# ------------------------------------------------------------------ parameters

def init_raw_params(key):
    """Raw weights in PyTorch convention (out_features, in_features)."""
    ks = jax.random.split(key, 13)
    s = 0.1
    return dict(
        emb_w=jax.random.normal(ks[0], (V, H), jnp.float32) * s,
        wa=jax.random.normal(ks[1], (LMAX, H + I), jnp.float32) * s,
        ba=jax.random.normal(ks[2], (LMAX,), jnp.float32) * s,
        wc=jax.random.normal(ks[3], (H, 2 * H), jnp.float32) * s,
        bc=jax.random.normal(ks[4], (H,), jnp.float32) * s,
        wp=jax.random.normal(ks[5], (I, H), jnp.float32) * s,
        bp=jax.random.normal(ks[6], (I,), jnp.float32) * s,
        w_ih=jax.random.normal(ks[7], (3 * I, H), jnp.float32) * s,
        w_hh=jax.random.normal(ks[8], (3 * I, I), jnp.float32) * s,
        b_ih=jax.random.normal(ks[9], (3 * I,), jnp.float32) * s,
        b_hh=jax.random.normal(ks[10], (3 * I,), jnp.float32) * s,
        wi=jax.random.normal(ks[11], (H, I), jnp.float32) * s,
        bi=jax.random.normal(ks[12], (H,), jnp.float32) * s,
    )


def prepare_kernel_params(raw):
    """Transpose / split / fuse / fold weights once for the fused kernel."""
    emb_w = raw["emb_w"]
    wo_t = emb_w.T                                   # shared_embed: output_linear weight, (H, V)
    wi_t = raw["wi"].T                               # (I, H)
    return dict(
        emb_w=emb_w,
        wp_t=raw["wp"].T, bp=raw["bp"].reshape(1, I),
        wa_e_t=raw["wa"][:, :H].T,                   # (H, LMAX)  emb part of attn
        wa_h_t=raw["wa"][:, H:].T,                   # (I, LMAX)  hidden part of attn
        ba=raw["ba"].reshape(1, LMAX),
        wc_e_t=raw["wc"][:, :H].T,                   # (H, H)     emb part of attn_combine
        wc_c_t=raw["wc"][:, H:].T,                   # (H, H)     ctx part of attn_combine
        bc=raw["bc"].reshape(1, H),
        # Fused GRU gate weights: PyTorch stores w_ih as (3I, H) with row-blocks [r; z; n],
        # so a plain transpose gives lane-concatenated gates [r | z | n] of width 3I.
        wih_t=raw["w_ih"].T,                         # (H, 3I) = (32, 192)
        whh_t=raw["w_hh"].T,                         # (I, 3I) = (64, 192)
        bih=raw["b_ih"].reshape(1, 3 * I),
        bhh=raw["b_hh"].reshape(1, 3 * I),
        w_out=wi_t @ wo_t,                           # (I, V)  folded intermediate+output proj
        b_out=raw["bi"].reshape(1, H) @ wo_t,        # (1, V)
    )


# ------------------------------------------------------------------ pure-JAX reference

def reference_forward(raw, tokens, enc_out, enc_hidden):
    emb = raw["emb_w"][tokens]                                            # (B, S, H)
    h = enc_hidden[0] @ raw["wp"].T + raw["bp"]                           # (B, I)
    attn_in = jnp.concatenate(
        [emb, jnp.broadcast_to(h[:, None, :], (B, S, I))], axis=2)
    score = jax.nn.softmax(attn_in @ raw["wa"].T + raw["ba"], axis=2)
    ctx = jnp.einsum("bsl,blh->bsh", score, enc_out)
    x = jnp.concatenate([emb, ctx], axis=2) @ raw["wc"].T + raw["bc"]

    w_ih = raw["w_ih"].reshape(3, I, H)
    w_hh = raw["w_hh"].reshape(3, I, I)
    b_ih = raw["b_ih"].reshape(3, I)
    b_hh = raw["b_hh"].reshape(3, I)

    def step(h_prev, x_t):
        r = jax.nn.sigmoid(x_t @ w_ih[0].T + b_ih[0] + h_prev @ w_hh[0].T + b_hh[0])
        z = jax.nn.sigmoid(x_t @ w_ih[1].T + b_ih[1] + h_prev @ w_hh[1].T + b_hh[1])
        n = jnp.tanh(x_t @ w_ih[2].T + b_ih[2] + r * (h_prev @ w_hh[2].T + b_hh[2]))
        h_new = (1.0 - z) * n + z * h_prev
        return h_new, h_new

    _, outs = lax.scan(step, h, jnp.transpose(x, (1, 0, 2)))
    gru_out = jnp.transpose(outs, (1, 0, 2))                              # (B, S, I)
    y = gru_out @ raw["wi"].T + raw["bi"]
    return y @ raw["emb_w"].T                                             # tied output weight


# ------------------------------------------------------------------ main

if __name__ == "__main__":
    key = jax.random.PRNGKey(0)
    kp, kt, ke, kh = jax.random.split(key, 4)
    raw = init_raw_params(kp)
    params = prepare_kernel_params(raw)
    prev_output_tokens = jax.random.randint(kt, (B, S), 0, V, dtype=jnp.int32)
    encoder_out = jax.random.normal(ke, (B, LMAX, H), jnp.float32)
    encoder_hidden = jax.random.normal(kh, (NUM_LAYERS, B, H), jnp.float32)

    logits = jax.block_until_ready(
        gru_decoder_forward(params, prev_output_tokens, encoder_out, encoder_hidden))
    ref = reference_forward(raw, prev_output_tokens, encoder_out, encoder_hidden)

    assert logits.shape == (B, S, V), logits.shape
    max_err = float(jnp.max(jnp.abs(logits - ref)))
    assert jnp.allclose(logits, ref, rtol=1e-3, atol=1e-3), max_err
    print("KERNEL_OK")
</pallas_src>

<mosaic_0001>
module attributes {stable_mosaic.version = 11 : i64} {
  func.func @gru_decoder_kernel(%arg0: memref<16x1xi32, #tpu.memory_space<vmem>>, %arg1: memref<128x32xf32, #tpu.memory_space<vmem>>, %arg2: memref<1x2x32xf32, #tpu.memory_space<vmem>>, %arg3: memref<32x64xf32, #tpu.memory_space<vmem>>, %arg4: memref<1x64xf32, #tpu.memory_space<vmem>>, %arg5: memref<32x16xf32, #tpu.memory_space<vmem>>, %arg6: memref<64x16xf32, #tpu.memory_space<vmem>>, %arg7: memref<1x16xf32, #tpu.memory_space<vmem>>, %arg8: memref<2x16x32xf32, #tpu.memory_space<vmem>>, %arg9: memref<32x32xf32, #tpu.memory_space<vmem>>, %arg10: memref<32x32xf32, #tpu.memory_space<vmem>>, %arg11: memref<1x32xf32, #tpu.memory_space<vmem>>, %arg12: memref<32x192xf32, #tpu.memory_space<vmem>>, %arg13: memref<1x192xf32, #tpu.memory_space<vmem>>, %arg14: memref<64x192xf32, #tpu.memory_space<vmem>>, %arg15: memref<1x192xf32, #tpu.memory_space<vmem>>, %arg16: memref<64x128xf32, #tpu.memory_space<vmem>>, %arg17: memref<1x128xf32, #tpu.memory_space<vmem>>, %arg18: memref<2x8x128xf32, #tpu.memory_space<vmem>>) attributes {dimension_semantics = [], scalar_prefetch = 0 : i64, scratch_operands = 0 : i64, tpu.core_type = #tpu.core_type<tc>} {
    %c0 = arith.constant 0 : index
    %c0_0 = arith.constant 0 : index
    %0 = vector.load %arg0[%c0, %c0_0] : memref<16x1xi32, #tpu.memory_space<vmem>>, vector<16x1xi32>
    %1 = tpu.iota {dimensions = array<i32: 1>} : vector<16x128xi32>
    %2 = vector.broadcast %0 : vector<16x1xi32> to vector<16x128xi32>
    %3 = arith.cmpi eq, %1, %2 : vector<16x128xi32>
    %4 = arith.extui %3 : vector<16x128xi1> to vector<16x128xi32>
    %5 = arith.sitofp %4 : vector<16x128xi32> to vector<16x128xf32>
    %c0_1 = arith.constant 0 : index
    %c0_2 = arith.constant 0 : index
    %6 = vector.load %arg1[%c0_1, %c0_2] : memref<128x32xf32, #tpu.memory_space<vmem>>, vector<128x32xf32>
    %cst = arith.constant dense<0.000000e+00> : vector<16x32xf32>
    %7 = tpu.matmul %5, %6, %cst {dimension_numbers = #tpu.dot_dimension_numbers<[1], [0], [0], [1], [0, 0, 1, 1], [], []>} : vector<16x128xf32>, vector<128x32xf32>, vector<16x32xf32> -> vector<16x32xf32>
    %c0_3 = arith.constant 0 : index
    %c0_4 = arith.constant 0 : index
    %c0_5 = arith.constant 0 : index
    %8 = vector.load %arg2[%c0_3, %c0_4, %c0_5] : memref<1x2x32xf32, #tpu.memory_space<vmem>>, vector<1x2x32xf32>
    %9 = vector.shape_cast %8 : vector<1x2x32xf32> to vector<2x32xf32>
    %c0_6 = arith.constant 0 : index
    %c0_7 = arith.constant 0 : index
    %10 = vector.load %arg3[%c0_6, %c0_7] : memref<32x64xf32, #tpu.memory_space<vmem>>, vector<32x64xf32>
    %cst_8 = arith.constant dense<0.000000e+00> : vector<2x64xf32>
    %11 = tpu.matmul %9, %10, %cst_8 {dimension_numbers = #tpu.dot_dimension_numbers<[1], [0], [0], [1], [0, 0, 1, 1], [], []>} : vector<2x32xf32>, vector<32x64xf32>, vector<2x64xf32> -> vector<2x64xf32>
    %c0_9 = arith.constant 0 : index
    %c0_10 = arith.constant 0 : index
    %12 = vector.load %arg4[%c0_9, %c0_10] : memref<1x64xf32, #tpu.memory_space<vmem>>, vector<1x64xf32>
    %13 = vector.broadcast %12 : vector<1x64xf32> to vector<2x64xf32>
    %14 = arith.addf %11, %13 : vector<2x64xf32>
    %c0_11 = arith.constant 0 : index
    %c0_12 = arith.constant 0 : index
    %15 = vector.load %arg6[%c0_11, %c0_12] : memref<64x16xf32, #tpu.memory_space<vmem>>, vector<64x16xf32>
    %cst_13 = arith.constant dense<0.000000e+00> : vector<2x16xf32>
    %16 = tpu.matmul %14, %15, %cst_13 {dimension_numbers = #tpu.dot_dimension_numbers<[1], [0], [0], [1], [0, 0, 1, 1], [], []>} : vector<2x64xf32>, vector<64x16xf32>, vector<2x16xf32> -> vector<2x16xf32>
    %c0_14 = arith.constant 0 : index
    %c0_15 = arith.constant 0 : index
    %17 = vector.load %arg7[%c0_14, %c0_15] : memref<1x16xf32, #tpu.memory_space<vmem>>, vector<1x16xf32>
    %18 = vector.broadcast %17 : vector<1x16xf32> to vector<2x16xf32>
    %19 = arith.addf %16, %18 : vector<2x16xf32>
    %c0_16 = arith.constant 0 : index
    %c0_17 = arith.constant 0 : index
    %20 = vector.load %arg5[%c0_16, %c0_17] : memref<32x16xf32, #tpu.memory_space<vmem>>, vector<32x16xf32>
    %cst_18 = arith.constant dense<0.000000e+00> : vector<16x16xf32>
    %21 = tpu.matmul %7, %20, %cst_18 {dimension_numbers = #tpu.dot_dimension_numbers<[1], [0], [0], [1], [0, 0, 1, 1], [], []>} : vector<16x32xf32>, vector<32x16xf32>, vector<16x16xf32> -> vector<16x16xf32>
    %22 = vector.shape_cast %21 : vector<16x16xf32> to vector<2x8x16xf32>
    %23 = vector.shape_cast %19 : vector<2x16xf32> to vector<2x1x16xf32>
    %24 = vector.broadcast %23 : vector<2x1x16xf32> to vector<2x8x16xf32>
    %25 = arith.addf %22, %24 : vector<2x8x16xf32>
    %cst_19 = arith.constant dense<0xFF800000> : vector<2x8xf32>
    %26 = vector.multi_reduction <maximumf>, %25, %cst_19 [2] : vector<2x8x16xf32> to vector<2x8xf32>
    %27 = vector.shape_cast %26 : vector<2x8xf32> to vector<2x8x1xf32>
    %28 = vector.broadcast %27 : vector<2x8x1xf32> to vector<2x8x16xf32>
    %29 = arith.subf %25, %28 : vector<2x8x16xf32>
    %30 = math.exp %29 : vector<2x8x16xf32>
    %cst_20 = arith.constant dense<0.000000e+00> : vector<2x8xf32>
    %31 = vector.multi_reduction <add>, %30, %cst_20 [2] : vector<2x8x16xf32> to vector<2x8xf32>
    %32 = vector.shape_cast %31 : vector<2x8xf32> to vector<2x8x1xf32>
    %33 = vector.broadcast %32 : vector<2x8x1xf32> to vector<2x8x16xf32>
    %34 = arith.divf %30, %33 : vector<2x8x16xf32>
    %c0_21 = arith.constant 0 : index
    %c0_22 = arith.constant 0 : index
    %c0_23 = arith.constant 0 : index
    %35 = vector.load %arg8[%c0_21, %c0_22, %c0_23] : memref<2x16x32xf32, #tpu.memory_space<vmem>>, vector<2x16x32xf32>
    "tpu.trace_start"() <{level = 10 : i32, message = "bsl,blh->bsh"}> : () -> ()
    %cst_24 = arith.constant dense<0.000000e+00> : vector<2x8x32xf32>
    %36 = tpu.matmul %34, %35, %cst_24 {dimension_numbers = #tpu.dot_dimension_numbers<[2], [1], [1], [2], [0, 0, 0, 1, 1, 2], [0], [0]>} : vector<2x8x16xf32>, vector<2x16x32xf32>, vector<2x8x32xf32> -> vector<2x8x32xf32>
    "tpu.trace_stop"() : () -> ()
    %37 = vector.shape_cast %36 : vector<2x8x32xf32> to vector<16x32xf32>
    %c0_25 = arith.constant 0 : index
    %c0_26 = arith.constant 0 : index
    %38 = vector.load %arg9[%c0_25, %c0_26] : memref<32x32xf32, #tpu.memory_space<vmem>>, vector<32x32xf32>
    %cst_27 = arith.constant dense<0.000000e+00> : vector<16x32xf32>
    %39 = tpu.matmul %7, %38, %cst_27 {dimension_numbers = #tpu.dot_dimension_numbers<[1], [0], [0], [1], [0, 0, 1, 1], [], []>} : vector<16x32xf32>, vector<32x32xf32>, vector<16x32xf32> -> vector<16x32xf32>
    %c0_28 = arith.constant 0 : index
    %c0_29 = arith.constant 0 : index
    %40 = vector.load %arg10[%c0_28, %c0_29] : memref<32x32xf32, #tpu.memory_space<vmem>>, vector<32x32xf32>
    %cst_30 = arith.constant dense<0.000000e+00> : vector<16x32xf32>
    %41 = tpu.matmul %37, %40, %cst_30 {dimension_numbers = #tpu.dot_dimension_numbers<[1], [0], [0], [1], [0, 0, 1, 1], [], []>} : vector<16x32xf32>, vector<32x32xf32>, vector<16x32xf32> -> vector<16x32xf32>
    %42 = arith.addf %39, %41 : vector<16x32xf32>
    %c0_31 = arith.constant 0 : index
    %c0_32 = arith.constant 0 : index
    %43 = vector.load %arg11[%c0_31, %c0_32] : memref<1x32xf32, #tpu.memory_space<vmem>>, vector<1x32xf32>
    %44 = vector.broadcast %43 : vector<1x32xf32> to vector<16x32xf32>
    %45 = arith.addf %42, %44 : vector<16x32xf32>
    %c0_33 = arith.constant 0 : index
    %c0_34 = arith.constant 0 : index
    %46 = vector.load %arg12[%c0_33, %c0_34] : memref<32x192xf32, #tpu.memory_space<vmem>>, vector<32x192xf32>
    %cst_35 = arith.constant dense<0.000000e+00> : vector<16x192xf32>
    %47 = tpu.matmul %45, %46, %cst_35 {dimension_numbers = #tpu.dot_dimension_numbers<[1], [0], [0], [1], [0, 0, 1, 1], [], []>} : vector<16x32xf32>, vector<32x192xf32>, vector<16x192xf32> -> vector<16x192xf32>
    %c0_36 = arith.constant 0 : index
    %c0_37 = arith.constant 0 : index
    %48 = vector.load %arg13[%c0_36, %c0_37] : memref<1x192xf32, #tpu.memory_space<vmem>>, vector<1x192xf32>
    %49 = vector.broadcast %48 : vector<1x192xf32> to vector<16x192xf32>
    %50 = arith.addf %47, %49 : vector<16x192xf32>
    %51 = vector.shape_cast %50 : vector<16x192xf32> to vector<2x8x192xf32>
    %c0_38 = arith.constant 0 : index
    %c0_39 = arith.constant 0 : index
    %52 = vector.load %arg14[%c0_38, %c0_39] : memref<64x192xf32, #tpu.memory_space<vmem>>, vector<64x192xf32>
    %c0_40 = arith.constant 0 : index
    %c0_41 = arith.constant 0 : index
    %53 = vector.load %arg15[%c0_40, %c0_41] : memref<1x192xf32, #tpu.memory_space<vmem>>, vector<1x192xf32>
    %cst_42 = arith.constant dense<0.000000e+00> : vector<2x192xf32>
    %54 = tpu.matmul %14, %52, %cst_42 {dimension_numbers = #tpu.dot_dimension_numbers<[1], [0], [0], [1], [0, 0, 1, 1], [], []>} : vector<2x64xf32>, vector<64x192xf32>, vector<2x192xf32> -> vector<2x192xf32>
    %55 = vector.broadcast %53 : vector<1x192xf32> to vector<2x192xf32>
    %56 = arith.addf %54, %55 : vector<2x192xf32>
    %57 = vector.extract_strided_slice %51 {offsets = [0, 0, 0], sizes = [2, 1, 192], strides = [1, 1, 1]} : vector<2x8x192xf32> to vector<2x1x192xf32>
    %58 = vector.shape_cast %57 : vector<2x1x192xf32> to vector<2x192xf32>
    %59 = vector.extract_strided_slice %58 {offsets = [0, 0], sizes = [2, 64], strides = [1, 1]} : vector<2x192xf32> to vector<2x64xf32>
    %60 = vector.extract_strided_slice %56 {offsets = [0, 0], sizes = [2, 64], strides = [1, 1]} : vector<2x192xf32> to vector<2x64xf32>
    %61 = arith.addf %59, %60 : vector<2x64xf32>
    %62 = arith.negf %61 : vector<2x64xf32>
    %63 = math.exp %62 : vector<2x64xf32>
    %cst_43 = arith.constant 1.000000e+00 : f32
    %64 = vector.broadcast %cst_43 : f32 to vector<2x64xf32>
    %65 = arith.addf %64, %63 : vector<2x64xf32>
    %66 = arith.divf %64, %65 : vector<2x64xf32>
    %67 = vector.extract_strided_slice %58 {offsets = [0, 64], sizes = [2, 64], strides = [1, 1]} : vector<2x192xf32> to vector<2x64xf32>
    %68 = vector.extract_strided_slice %56 {offsets = [0, 64], sizes = [2, 64], strides = [1, 1]} : vector<2x192xf32> to vector<2x64xf32>
    %69 = arith.addf %67, %68 : vector<2x64xf32>
    %70 = arith.negf %69 : vector<2x64xf32>
    %71 = math.exp %70 : vector<2x64xf32>
    %cst_44 = arith.constant 1.000000e+00 : f32
    %72 = vector.broadcast %cst_44 : f32 to vector<2x64xf32>
    %73 = arith.addf %72, %71 : vector<2x64xf32>
    %74 = arith.divf %72, %73 : vector<2x64xf32>
    %75 = vector.extract_strided_slice %58 {offsets = [0, 128], sizes = [2, 64], strides = [1, 1]} : vector<2x192xf32> to vector<2x64xf32>
    %76 = vector.extract_strided_slice %56 {offsets = [0, 128], sizes = [2, 64], strides = [1, 1]} : vector<2x192xf32> to vector<2x64xf32>
    %77 = arith.mulf %66, %76 : vector<2x64xf32>
    %78 = arith.addf %75, %77 : vector<2x64xf32>
    %79 = math.tanh %78 : vector<2x64xf32>
    %cst_45 = arith.constant 1.000000e+00 : f32
    %80 = vector.broadcast %cst_45 : f32 to vector<2x64xf32>
    %81 = arith.subf %80, %74 : vector<2x64xf32>
    %82 = arith.mulf %81, %79 : vector<2x64xf32>
    %83 = arith.mulf %74, %14 : vector<2x64xf32>
    %84 = arith.addf %82, %83 : vector<2x64xf32>
    %cst_46 = arith.constant dense<0.000000e+00> : vector<2x192xf32>
    %85 = tpu.matmul %84, %52, %cst_46 {dimension_numbers = #tpu.dot_dimension_numbers<[1], [0], [0], [1], [0, 0, 1, 1], [], []>} : vector<2x64xf32>, vector<64x192xf32>, vector<2x192xf32> -> vector<2x192xf32>
    %86 = vector.broadcast %53 : vector<1x192xf32> to vector<2x192xf32>
    %87 = arith.addf %85, %86 : vector<2x192xf32>
    %88 = vector.extract_strided_slice %51 {offsets = [0, 1, 0], sizes = [2, 1, 192], strides = [1, 1, 1]} : vector<2x8x192xf32> to vector<2x1x192xf32>
    %89 = vector.shape_cast %88 : vector<2x1x192xf32> to vector<2x192xf32>
    %90 = vector.extract_strided_slice %89 {offsets = [0, 0], sizes = [2, 64], strides = [1, 1]} : vector<2x192xf32> to vector<2x64xf32>
    %91 = vector.extract_strided_slice %87 {offsets = [0, 0], sizes = [2, 64], strides = [1, 1]} : vector<2x192xf32> to vector<2x64xf32>
    %92 = arith.addf %90, %91 : vector<2x64xf32>
    %93 = arith.negf %92 : vector<2x64xf32>
    %94 = math.exp %93 : vector<2x64xf32>
    %cst_47 = arith.constant 1.000000e+00 : f32
    %95 = vector.broadcast %cst_47 : f32 to vector<2x64xf32>
    %96 = arith.addf %95, %94 : vector<2x64xf32>
    %97 = arith.divf %95, %96 : vector<2x64xf32>
    %98 = vector.extract_strided_slice %89 {offsets = [0, 64], sizes = [2, 64], strides = [1, 1]} : vector<2x192xf32> to vector<2x64xf32>
    %99 = vector.extract_strided_slice %87 {offsets = [0, 64], sizes = [2, 64], strides = [1, 1]} : vector<2x192xf32> to vector<2x64xf32>
    %100 = arith.addf %98, %99 : vector<2x64xf32>
    %101 = arith.negf %100 : vector<2x64xf32>
    %102 = math.exp %101 : vector<2x64xf32>
    %cst_48 = arith.constant 1.000000e+00 : f32
    %103 = vector.broadcast %cst_48 : f32 to vector<2x64xf32>
    %104 = arith.addf %103, %102 : vector<2x64xf32>
    %105 = arith.divf %103, %104 : vector<2x64xf32>
    %106 = vector.extract_strided_slice %89 {offsets = [0, 128], sizes = [2, 64], strides = [1, 1]} : vector<2x192xf32> to vector<2x64xf32>
    %107 = vector.extract_strided_slice %87 {offsets = [0, 128], sizes = [2, 64], strides = [1, 1]} : vector<2x192xf32> to vector<2x64xf32>
    %108 = arith.mulf %97, %107 : vector<2x64xf32>
    %109 = arith.addf %106, %108 : vector<2x64xf32>
    %110 = math.tanh %109 : vector<2x64xf32>
    %cst_49 = arith.constant 1.000000e+00 : f32
    %111 = vector.broadcast %cst_49 : f32 to vector<2x64xf32>
    %112 = arith.subf %111, %105 : vector<2x64xf32>
    %113 = arith.mulf %112, %110 : vector<2x64xf32>
    %114 = arith.mulf %105, %84 : vector<2x64xf32>
    %115 = arith.addf %113, %114 : vector<2x64xf32>
    %cst_50 = arith.constant dense<0.000000e+00> : vector<2x192xf32>
    %116 = tpu.matmul %115, %52, %cst_50 {dimension_numbers = #tpu.dot_dimension_numbers<[1], [0], [0], [1], [0, 0, 1, 1], [], []>} : vector<2x64xf32>, vector<64x192xf32>, vector<2x192xf32> -> vector<2x192xf32>
    %117 = vector.broadcast %53 : vector<1x192xf32> to vector<2x192xf32>
    %118 = arith.addf %116, %117 : vector<2x192xf32>
    %119 = vector.extract_strided_slice %51 {offsets = [0, 2, 0], sizes = [2, 1, 192], strides = [1, 1, 1]} : vector<2x8x192xf32> to vector<2x1x192xf32>
    %120 = vector.shape_cast %119 : vector<2x1x192xf32> to vector<2x192xf32>
    %121 = vector.extract_strided_slice %120 {offsets = [0, 0], sizes = [2, 64], strides = [1, 1]} : vector<2x192xf32> to vector<2x64xf32>
    %122 = vector.extract_strided_slice %118 {offsets = [0, 0], sizes = [2, 64], strides = [1, 1]} : vector<2x192xf32> to vector<2x64xf32>
    %123 = arith.addf %121, %122 : vector<2x64xf32>
    %124 = arith.negf %123 : vector<2x64xf32>
    %125 = math.exp %124 : vector<2x64xf32>
    %cst_51 = arith.constant 1.000000e+00 : f32
    %126 = vector.broadcast %cst_51 : f32 to vector<2x64xf32>
    %127 = arith.addf %126, %125 : vector<2x64xf32>
    %128 = arith.divf %126, %127 : vector<2x64xf32>
    %129 = vector.extract_strided_slice %120 {offsets = [0, 64], sizes = [2, 64], strides = [1, 1]} : vector<2x192xf32> to vector<2x64xf32>
    %130 = vector.extract_strided_slice %118 {offsets = [0, 64], sizes = [2, 64], strides = [1, 1]} : vector<2x192xf32> to vector<2x64xf32>
    %131 = arith.addf %129, %130 : vector<2x64xf32>
    %132 = arith.negf %131 : vector<2x64xf32>
    %133 = math.exp %132 : vector<2x64xf32>
    %cst_52 = arith.constant 1.000000e+00 : f32
    %134 = vector.broadcast %cst_52 : f32 to vector<2x64xf32>
    %135 = arith.addf %134, %133 : vector<2x64xf32>
    %136 = arith.divf %134, %135 : vector<2x64xf32>
    %137 = vector.extract_strided_slice %120 {offsets = [0, 128], sizes = [2, 64], strides = [1, 1]} : vector<2x192xf32> to vector<2x64xf32>
    %138 = vector.extract_strided_slice %118 {offsets = [0, 128], sizes = [2, 64], strides = [1, 1]} : vector<2x192xf32> to vector<2x64xf32>
    %139 = arith.mulf %128, %138 : vector<2x64xf32>
    %140 = arith.addf %137, %139 : vector<2x64xf32>
    %141 = math.tanh %140 : vector<2x64xf32>
    %cst_53 = arith.constant 1.000000e+00 : f32
    %142 = vector.broadcast %cst_53 : f32 to vector<2x64xf32>
    %143 = arith.subf %142, %136 : vector<2x64xf32>
    %144 = arith.mulf %143, %141 : vector<2x64xf32>
    %145 = arith.mulf %136, %115 : vector<2x64xf32>
    %146 = arith.addf %144, %145 : vector<2x64xf32>
    %cst_54 = arith.constant dense<0.000000e+00> : vector<2x192xf32>
    %147 = tpu.matmul %146, %52, %cst_54 {dimension_numbers = #tpu.dot_dimension_numbers<[1], [0], [0], [1], [0, 0, 1, 1], [], []>} : vector<2x64xf32>, vector<64x192xf32>, vector<2x192xf32> -> vector<2x192xf32>
    %148 = vector.broadcast %53 : vector<1x192xf32> to vector<2x192xf32>
    %149 = arith.addf %147, %148 : vector<2x192xf32>
    %150 = vector.extract_strided_slice %51 {offsets = [0, 3, 0], sizes = [2, 1, 192], strides = [1, 1, 1]} : vector<2x8x192xf32> to vector<2x1x192xf32>
    %151 = vector.shape_cast %150 : vector<2x1x192xf32> to vector<2x192xf32>
    %152 = vector.extract_strided_slice %151 {offsets = [0, 0], sizes = [2, 64], strides = [1, 1]} : vector<2x192xf32> to vector<2x64xf32>
    %153 = vector.extract_strided_slice %149 {offsets = [0, 0], sizes = [2, 64], strides = [1, 1]} : vector<2x192xf32> to vector<2x64xf32>
    %154 = arith.addf %152, %153 : vector<2x64xf32>
    %155 = arith.negf %154 : vector<2x64xf32>
    %156 = math.exp %155 : vector<2x64xf32>
    %cst_55 = arith.constant 1.000000e+00 : f32
    %157 = vector.broadcast %cst_55 : f32 to vector<2x64xf32>
    %158 = arith.addf %157, %156 : vector<2x64xf32>
    %159 = arith.divf %157, %158 : vector<2x64xf32>
    %160 = vector.extract_strided_slice %151 {offsets = [0, 64], sizes = [2, 64], strides = [1, 1]} : vector<2x192xf32> to vector<2x64xf32>
    %161 = vector.extract_strided_slice %149 {offsets = [0, 64], sizes = [2, 64], strides = [1, 1]} : vector<2x192xf32> to vector<2x64xf32>
    %162 = arith.addf %160, %161 : vector<2x64xf32>
    %163 = arith.negf %162 : vector<2x64xf32>
    %164 = math.exp %163 : vector<2x64xf32>
    %cst_56 = arith.constant 1.000000e+00 : f32
    %165 = vector.broadcast %cst_56 : f32 to vector<2x64xf32>
    %166 = arith.addf %165, %164 : vector<2x64xf32>
    %167 = arith.divf %165, %166 : vector<2x64xf32>
    %168 = vector.extract_strided_slice %151 {offsets = [0, 128], sizes = [2, 64], strides = [1, 1]} : vector<2x192xf32> to vector<2x64xf32>
    %169 = vector.extract_strided_slice %149 {offsets = [0, 128], sizes = [2, 64], strides = [1, 1]} : vector<2x192xf32> to vector<2x64xf32>
    %170 = arith.mulf %159, %169 : vector<2x64xf32>
    %171 = arith.addf %168, %170 : vector<2x64xf32>
    %172 = math.tanh %171 : vector<2x64xf32>
    %cst_57 = arith.constant 1.000000e+00 : f32
    %173 = vector.broadcast %cst_57 : f32 to vector<2x64xf32>
    %174 = arith.subf %173, %167 : vector<2x64xf32>
    %175 = arith.mulf %174, %172 : vector<2x64xf32>
    %176 = arith.mulf %167, %146 : vector<2x64xf32>
    %177 = arith.addf %175, %176 : vector<2x64xf32>
    %cst_58 = arith.constant dense<0.000000e+00> : vector<2x192xf32>
    %178 = tpu.matmul %177, %52, %cst_58 {dimension_numbers = #tpu.dot_dimension_numbers<[1], [0], [0], [1], [0, 0, 1, 1], [], []>} : vector<2x64xf32>, vector<64x192xf32>, vector<2x192xf32> -> vector<2x192xf32>
    %179 = vector.broadcast %53 : vector<1x192xf32> to vector<2x192xf32>
    %180 = arith.addf %178, %179 : vector<2x192xf32>
    %181 = vector.extract_strided_slice %51 {offsets = [0, 4, 0], sizes = [2, 1, 192], strides = [1, 1, 1]} : vector<2x8x192xf32> to vector<2x1x192xf32>
    %182 = vector.shape_cast %181 : vector<2x1x192xf32> to vector<2x192xf32>
    %183 = vector.extract_strided_slice %182 {offsets = [0, 0], sizes = [2, 64], strides = [1, 1]} : vector<2x192xf32> to vector<2x64xf32>
    %184 = vector.extract_strided_slice %180 {offsets = [0, 0], sizes = [2, 64], strides = [1, 1]} : vector<2x192xf32> to vector<2x64xf32>
    %185 = arith.addf %183, %184 : vector<2x64xf32>
    %186 = arith.negf %185 : vector<2x64xf32>
    %187 = math.exp %186 : vector<2x64xf32>
    %cst_59 = arith.constant 1.000000e+00 : f32
    %188 = vector.broadcast %cst_59 : f32 to vector<2x64xf32>
    %189 = arith.addf %188, %187 : vector<2x64xf32>
    %190 = arith.divf %188, %189 : vector<2x64xf32>
    %191 = vector.extract_strided_slice %182 {offsets = [0, 64], sizes = [2, 64], strides = [1, 1]} : vector<2x192xf32> to vector<2x64xf32>
    %192 = vector.extract_strided_slice %180 {offsets = [0, 64], sizes = [2, 64], strides = [1, 1]} : vector<2x192xf32> to vector<2x64xf32>
    %193 = arith.addf %191, %192 : vector<2x64xf32>
    %194 = arith.negf %193 : vector<2x64xf32>
    %195 = math.exp %194 : vector<2x64xf32>
    %cst_60 = arith.constant 1.000000e+00 : f32
    %196 = vector.broadcast %cst_60 : f32 to vector<2x64xf32>
    %197 = arith.addf %196, %195 : vector<2x64xf32>
    %198 = arith.divf %196, %197 : vector<2x64xf32>
    %199 = vector.extract_strided_slice %182 {offsets = [0, 128], sizes = [2, 64], strides = [1, 1]} : vector<2x192xf32> to vector<2x64xf32>
    %200 = vector.extract_strided_slice %180 {offsets = [0, 128], sizes = [2, 64], strides = [1, 1]} : vector<2x192xf32> to vector<2x64xf32>
    %201 = arith.mulf %190, %200 : vector<2x64xf32>
    %202 = arith.addf %199, %201 : vector<2x64xf32>
    %203 = math.tanh %202 : vector<2x64xf32>
    %cst_61 = arith.constant 1.000000e+00 : f32
    %204 = vector.broadcast %cst_61 : f32 to vector<2x64xf32>
    %205 = arith.subf %204, %198 : vector<2x64xf32>
    %206 = arith.mulf %205, %203 : vector<2x64xf32>
    %207 = arith.mulf %198, %177 : vector<2x64xf32>
    %208 = arith.addf %206, %207 : vector<2x64xf32>
    %cst_62 = arith.constant dense<0.000000e+00> : vector<2x192xf32>
    %209 = tpu.matmul %208, %52, %cst_62 {dimension_numbers = #tpu.dot_dimension_numbers<[1], [0], [0], [1], [0, 0, 1, 1], [], []>} : vector<2x64xf32>, vector<64x192xf32>, vector<2x192xf32> -> vector<2x192xf32>
    %210 = vector.broadcast %53 : vector<1x192xf32> to vector<2x192xf32>
    %211 = arith.addf %209, %210 : vector<2x192xf32>
    %212 = vector.extract_strided_slice %51 {offsets = [0, 5, 0], sizes = [2, 1, 192], strides = [1, 1, 1]} : vector<2x8x192xf32> to vector<2x1x192xf32>
    %213 = vector.shape_cast %212 : vector<2x1x192xf32> to vector<2x192xf32>
    %214 = vector.extract_strided_slice %213 {offsets = [0, 0], sizes = [2, 64], strides = [1, 1]} : vector<2x192xf32> to vector<2x64xf32>
    %215 = vector.extract_strided_slice %211 {offsets = [0, 0], sizes = [2, 64], strides = [1, 1]} : vector<2x192xf32> to vector<2x64xf32>
    %216 = arith.addf %214, %215 : vector<2x64xf32>
    %217 = arith.negf %216 : vector<2x64xf32>
    %218 = math.exp %217 : vector<2x64xf32>
    %cst_63 = arith.constant 1.000000e+00 : f32
    %219 = vector.broadcast %cst_63 : f32 to vector<2x64xf32>
    %220 = arith.addf %219, %218 : vector<2x64xf32>
    %221 = arith.divf %219, %220 : vector<2x64xf32>
    %222 = vector.extract_strided_slice %213 {offsets = [0, 64], sizes = [2, 64], strides = [1, 1]} : vector<2x192xf32> to vector<2x64xf32>
    %223 = vector.extract_strided_slice %211 {offsets = [0, 64], sizes = [2, 64], strides = [1, 1]} : vector<2x192xf32> to vector<2x64xf32>
    %224 = arith.addf %222, %223 : vector<2x64xf32>
    %225 = arith.negf %224 : vector<2x64xf32>
    %226 = math.exp %225 : vector<2x64xf32>
    %cst_64 = arith.constant 1.000000e+00 : f32
    %227 = vector.broadcast %cst_64 : f32 to vector<2x64xf32>
    %228 = arith.addf %227, %226 : vector<2x64xf32>
    %229 = arith.divf %227, %228 : vector<2x64xf32>
    %230 = vector.extract_strided_slice %213 {offsets = [0, 128], sizes = [2, 64], strides = [1, 1]} : vector<2x192xf32> to vector<2x64xf32>
    %231 = vector.extract_strided_slice %211 {offsets = [0, 128], sizes = [2, 64], strides = [1, 1]} : vector<2x192xf32> to vector<2x64xf32>
    %232 = arith.mulf %221, %231 : vector<2x64xf32>
    %233 = arith.addf %230, %232 : vector<2x64xf32>
    %234 = math.tanh %233 : vector<2x64xf32>
    %cst_65 = arith.constant 1.000000e+00 : f32
    %235 = vector.broadcast %cst_65 : f32 to vector<2x64xf32>
    %236 = arith.subf %235, %229 : vector<2x64xf32>
    %237 = arith.mulf %236, %234 : vector<2x64xf32>
    %238 = arith.mulf %229, %208 : vector<2x64xf32>
    %239 = arith.addf %237, %238 : vector<2x64xf32>
    %cst_66 = arith.constant dense<0.000000e+00> : vector<2x192xf32>
    %240 = tpu.matmul %239, %52, %cst_66 {dimension_numbers = #tpu.dot_dimension_numbers<[1], [0], [0], [1], [0, 0, 1, 1], [], []>} : vector<2x64xf32>, vector<64x192xf32>, vector<2x192xf32> -> vector<2x192xf32>
    %241 = vector.broadcast %53 : vector<1x192xf32> to vector<2x192xf32>
    %242 = arith.addf %240, %241 : vector<2x192xf32>
    %243 = vector.extract_strided_slice %51 {offsets = [0, 6, 0], sizes = [2, 1, 192], strides = [1, 1, 1]} : vector<2x8x192xf32> to vector<2x1x192xf32>
    %244 = vector.shape_cast %243 : vector<2x1x192xf32> to vector<2x192xf32>
    %245 = vector.extract_strided_slice %244 {offsets = [0, 0], sizes = [2, 64], strides = [1, 1]} : vector<2x192xf32> to vector<2x64xf32>
    %246 = vector.extract_strided_slice %242 {offsets = [0, 0], sizes = [2, 64], strides = [1, 1]} : vector<2x192xf32> to vector<2x64xf32>
    %247 = arith.addf %245, %246 : vector<2x64xf32>
    %248 = arith.negf %247 : vector<2x64xf32>
    %249 = math.exp %248 : vector<2x64xf32>
    %cst_67 = arith.constant 1.000000e+00 : f32
    %250 = vector.broadcast %cst_67 : f32 to vector<2x64xf32>
    %251 = arith.addf %250, %249 : vector<2x64xf32>
    %252 = arith.divf %250, %251 : vector<2x64xf32>
    %253 = vector.extract_strided_slice %244 {offsets = [0, 64], sizes = [2, 64], strides = [1, 1]} : vector<2x192xf32> to vector<2x64xf32>
    %254 = vector.extract_strided_slice %242 {offsets = [0, 64], sizes = [2, 64], strides = [1, 1]} : vector<2x192xf32> to vector<2x64xf32>
    %255 = arith.addf %253, %254 : vector<2x64xf32>
    %256 = arith.negf %255 : vector<2x64xf32>
    %257 = math.exp %256 : vector<2x64xf32>
    %cst_68 = arith.constant 1.000000e+00 : f32
    %258 = vector.broadcast %cst_68 : f32 to vector<2x64xf32>
    %259 = arith.addf %258, %257 : vector<2x64xf32>
    %260 = arith.divf %258, %259 : vector<2x64xf32>
    %261 = vector.extract_strided_slice %244 {offsets = [0, 128], sizes = [2, 64], strides = [1, 1]} : vector<2x192xf32> to vector<2x64xf32>
    %262 = vector.extract_strided_slice %242 {offsets = [0, 128], sizes = [2, 64], strides = [1, 1]} : vector<2x192xf32> to vector<2x64xf32>
    %263 = arith.mulf %252, %262 : vector<2x64xf32>
    %264 = arith.addf %261, %263 : vector<2x64xf32>
    %265 = math.tanh %264 : vector<2x64xf32>
    %cst_69 = arith.constant 1.000000e+00 : f32
    %266 = vector.broadcast %cst_69 : f32 to vector<2x64xf32>
    %267 = arith.subf %266, %260 : vector<2x64xf32>
    %268 = arith.mulf %267, %265 : vector<2x64xf32>
    %269 = arith.mulf %260, %239 : vector<2x64xf32>
    %270 = arith.addf %268, %269 : vector<2x64xf32>
    %cst_70 = arith.constant dense<0.000000e+00> : vector<2x192xf32>
    %271 = tpu.matmul %270, %52, %cst_70 {dimension_numbers = #tpu.dot_dimension_numbers<[1], [0], [0], [1], [0, 0, 1, 1], [], []>} : vector<2x64xf32>, vector<64x192xf32>, vector<2x192xf32> -> vector<2x192xf32>
    %272 = vector.broadcast %53 : vector<1x192xf32> to vector<2x192xf32>
    %273 = arith.addf %271, %272 : vector<2x192xf32>
    %274 = vector.extract_strided_slice %51 {offsets = [0, 7, 0], sizes = [2, 1, 192], strides = [1, 1, 1]} : vector<2x8x192xf32> to vector<2x1x192xf32>
    %275 = vector.shape_cast %274 : vector<2x1x192xf32> to vector<2x192xf32>
    %276 = vector.extract_strided_slice %275 {offsets = [0, 0], sizes = [2, 64], strides = [1, 1]} : vector<2x192xf32> to vector<2x64xf32>
    %277 = vector.extract_strided_slice %273 {offsets = [0, 0], sizes = [2, 64], strides = [1, 1]} : vector<2x192xf32> to vector<2x64xf32>
    %278 = arith.addf %276, %277 : vector<2x64xf32>
    %279 = arith.negf %278 : vector<2x64xf32>
    %280 = math.exp %279 : vector<2x64xf32>
    %cst_71 = arith.constant 1.000000e+00 : f32
    %281 = vector.broadcast %cst_71 : f32 to vector<2x64xf32>
    %282 = arith.addf %281, %280 : vector<2x64xf32>
    %283 = arith.divf %281, %282 : vector<2x64xf32>
    %284 = vector.extract_strided_slice %275 {offsets = [0, 64], sizes = [2, 64], strides = [1, 1]} : vector<2x192xf32> to vector<2x64xf32>
    %285 = vector.extract_strided_slice %273 {offsets = [0, 64], sizes = [2, 64], strides = [1, 1]} : vector<2x192xf32> to vector<2x64xf32>
    %286 = arith.addf %284, %285 : vector<2x64xf32>
    %287 = arith.negf %286 : vector<2x64xf32>
    %288 = math.exp %287 : vector<2x64xf32>
    %cst_72 = arith.constant 1.000000e+00 : f32
    %289 = vector.broadcast %cst_72 : f32 to vector<2x64xf32>
    %290 = arith.addf %289, %288 : vector<2x64xf32>
    %291 = arith.divf %289, %290 : vector<2x64xf32>
    %292 = vector.extract_strided_slice %275 {offsets = [0, 128], sizes = [2, 64], strides = [1, 1]} : vector<2x192xf32> to vector<2x64xf32>
    %293 = vector.extract_strided_slice %273 {offsets = [0, 128], sizes = [2, 64], strides = [1, 1]} : vector<2x192xf32> to vector<2x64xf32>
    %294 = arith.mulf %283, %293 : vector<2x64xf32>
    %295 = arith.addf %292, %294 : vector<2x64xf32>
    %296 = math.tanh %295 : vector<2x64xf32>
    %cst_73 = arith.constant 1.000000e+00 : f32
    %297 = vector.broadcast %cst_73 : f32 to vector<2x64xf32>
    %298 = arith.subf %297, %291 : vector<2x64xf32>
    %299 = arith.mulf %298, %296 : vector<2x64xf32>
    %300 = arith.mulf %291, %270 : vector<2x64xf32>
    %301 = arith.addf %299, %300 : vector<2x64xf32>
    %302 = vector.shape_cast %84 : vector<2x64xf32> to vector<2x1x64xf32>
    %303 = vector.shape_cast %115 : vector<2x64xf32> to vector<2x1x64xf32>
    %304 = vector.shape_cast %146 : vector<2x64xf32> to vector<2x1x64xf32>
    %305 = vector.shape_cast %177 : vector<2x64xf32> to vector<2x1x64xf32>
    %306 = vector.shape_cast %208 : vector<2x64xf32> to vector<2x1x64xf32>
    %307 = vector.shape_cast %239 : vector<2x64xf32> to vector<2x1x64xf32>
    %308 = vector.shape_cast %270 : vector<2x64xf32> to vector<2x1x64xf32>
    %309 = vector.shape_cast %301 : vector<2x64xf32> to vector<2x1x64xf32>
    %310 = tpu.concatenate %302, %303, %304, %305, %306, %307, %308, %309 in 1 : vector<2x1x64xf32>, vector<2x1x64xf32>, vector<2x1x64xf32>, vector<2x1x64xf32>, vector<2x1x64xf32>, vector<2x1x64xf32>, vector<2x1x64xf32>, vector<2x1x64xf32> -> vector<2x8x64xf32>
    %311 = vector.shape_cast %310 : vector<2x8x64xf32> to vector<16x64xf32>
    %c0_74 = arith.constant 0 : index
    %c0_75 = arith.constant 0 : index
    %312 = vector.load %arg16[%c0_74, %c0_75] : memref<64x128xf32, #tpu.memory_space<vmem>>, vector<64x128xf32>
    %cst_76 = arith.constant dense<0.000000e+00> : vector<16x128xf32>
    %313 = tpu.matmul %311, %312, %cst_76 {dimension_numbers = #tpu.dot_dimension_numbers<[1], [0], [0], [1], [0, 0, 1, 1], [], []>} : vector<16x64xf32>, vector<64x128xf32>, vector<16x128xf32> -> vector<16x128xf32>
    %c0_77 = arith.constant 0 : index
    %c0_78 = arith.constant 0 : index
    %314 = vector.load %arg17[%c0_77, %c0_78] : memref<1x128xf32, #tpu.memory_space<vmem>>, vector<1x128xf32>
    %315 = vector.broadcast %314 : vector<1x128xf32> to vector<16x128xf32>
    %316 = arith.addf %313, %315 : vector<16x128xf32>
    %317 = vector.shape_cast %316 : vector<16x128xf32> to vector<2x8x128xf32>
    %c0_79 = arith.constant 0 : index
    %c0_80 = arith.constant 0 : index
    %c0_81 = arith.constant 0 : index
    %318 = vector.load %arg18[%c0_79, %c0_80, %c0_81] : memref<2x8x128xf32, #tpu.memory_space<vmem>>, vector<2x8x128xf32>
    tpu.vector_store %arg18[%c0_79, %c0_80, %c0_81], %317 {strides = array<i32>} : memref<2x8x128xf32, #tpu.memory_space<vmem>>, vector<2x8x128xf32>,
    return
  }
}

</mosaic_0001>

<bundles_post_ra>
// kernel: gru_decoder_forward.1
= control target key start
LH: loop header
LB: loop body
LE: loop exit
PB: predicated region body
PF: predicated region fallthrough
CT: control target
= control target key end

     0   :  { %s3701_s0 = inlined_call_operand.vmem [shape: s32[16,1], index: 0, kind: input, shape index: {}]   ;;  %s3702_s1 = inlined_call_operand.vmem [shape: f32[128,32], index: 1, kind: input, shape index: {}]   ;;  %s3703_s2 = inlined_call_operand.vmem [shape: f32[1,2,32], index: 2, kind: input, shape index: {}]   ;;  %s3704_s3 = inlined_call_operand.vmem [shape: f32[32,64], index: 3, kind: input, shape index: {}]   ;;  %s3705_s4 = inlined_call_operand.vmem [shape: f32[1,64], index: 4, kind: input, shape index: {}]   ;;  %s3706_s5 = inlined_call_operand.vmem [shape: f32[32,16], index: 5, kind: input, shape index: {}]   ;;  %s3707_s6 = inlined_call_operand.vmem [shape: f32[64,16], index: 6, kind: input, shape index: {}]   ;;  %s3708_s7 = inlined_call_operand.hbm [shape: f32[1,16], index: 7, kind: input, shape index: {}]   ;;  %s3709_s8 = inlined_call_operand.vmem [shape: f32[2,16,32], index: 8, kind: input, shape index: {}]   ;;  %s3710_s9 = inlined_call_operand.hbm [shape: f32[32,32], index: 9, kind: input, shape index: {}]   ;;  %s3711_s10 = inlined_call_operand.hbm [shape: f32[32,32], index: 10, kind: input, shape index: {}]   ;;  %s3712_s11 = inlined_call_operand.hbm [shape: f32[1,32], index: 11, kind: input, shape index: {}]   ;;  %s3713_s12 = inlined_call_operand.vmem [shape: f32[32,192], index: 12, kind: input, shape index: {}]   ;;  %s3714_s13 = inlined_call_operand.hbm [shape: f32[1,192], index: 13, kind: input, shape index: {}]   ;;  %s3715_s14 = inlined_call_operand.vmem [shape: f32[64,192], index: 14, kind: input, shape index: {}]   ;;  %s3716_s15 = inlined_call_operand.hbm [shape: f32[1,192], index: 15, kind: input, shape index: {}]   ;;  %s3717_s16 = inlined_call_operand.vmem [shape: f32[64,128], index: 16, kind: input, shape index: {}]   ;;  %s3718_s17 = inlined_call_operand.hbm [shape: f32[1,128], index: 17, kind: input, shape index: {}]   ;;  %s3719_s18 = inlined_call_operand.hbm [shape: f32[2,8,128], index: 18, kind: output, shape index: {}]  }
   0x1   :  { %3723 = sst [smem:[#allocation20_spill]] %s3701_s0 }
   0x2   :  { %3724 = sst [smem:[#allocation21_spill]] %s3702_s1 }
   0x3   :  { %3725 = sst [smem:[#allocation22_spill]] %s3703_s2 }
   0x4   :  { %3726 = sst [smem:[#allocation23_spill]] %s3719_s18 }
   0x5   :  { %23 = vsyncpa [#allocation3], 0 }
   0x6   :  { %24 = vsyncpa [#allocation6], 0 }
   0x7   :  { %25 = vsyncpa [#allocation9], 0 }
   0x8   :  { %26 = vsyncpa [#allocation12], 0 }
   0x9   :  { %27 = vsyncpa [#allocation4], 0  ;;  %s2980_s27 = smov [#allocation5]   ;;  %s2794_s0 = scalar_lea.hbm %s3710_s9, 512 }
   0xa   :  { %s59_s28 = sshll.u32 %s2980_s27, 4  ;;  %p2795_p0 = scmp.ne.s32.totalorder %s3710_s9, %s2794_s0  ;;  %s60_s28 = int_to_ptr.vmem [resolvable:$true] %s59_s28 }
   0xb   :  { %p2798_p1 = scmp.lt.u32.totalorder %s2794_s0, %s3710_s9 }
   0xd   :  { %p2800_p2 = pnand %p2798_p1, %p2795_p0 }
   0xf   :  { %2803 = shalt.err (!%p2800_p2)
}
  0x10   :  { %s2804_s22 = scalar_lea.vmem %s60_s28, 512  ;;  %p2809_p4 = scmp.lt.s32.totalorder %s60_s28, %s60_s28 }
  0x11   :  { %p2805_p3 = scmp.ne.s32.totalorder %s60_s28, %s2804_s22  ;;  %p2810_p5 = scmp.lt.s32.totalorder %s2804_s22, %s2804_s22 }
  0x13   :  { %p2811_p6 = por %p2810_p5, %p2809_p4 }
  0x15   :  { %p2812_p7 = pnand %p2811_p6, %p2805_p3 }
  0x17   :  { %2815 = shalt.err (!%p2812_p7)
}
  0x18   :  { %s2981_s2 = smov 128   ;;  %s2982_s23 = smov 8  }
  0x19   :  { %65 = dma.hbm_to_vmem [thread:$0]  %s3710_s9, 512, %s60_s28, [#allocation6], %s2981_s2, %s2981_s2, %s2982_s23  }
  0x1a   :  { %s2983_s26 = smov [#allocation8]   ;;  %s2984_s29 = smov [#allocation11]  }
  0x1b   :  { %s84_s27 = sshll.u32 %s2983_s26, 4  ;;  %s108_s30 = sshll.u32 %s2984_s29, 4  ;;  %s85_s27 = int_to_ptr.vmem [resolvable:$true] %s84_s27  ;;  %s109_s30 = int_to_ptr.vmem [resolvable:$true] %s108_s30 }
  0x1c   :  { %s2816_s1 = scalar_lea.hbm %s3712_s11, 16 }
  0x1d   :  { %p2817_p8 = scmp.ne.s32.totalorder %s3712_s11, %s2816_s1  ;;  %p2820_p9 = scmp.lt.u32.totalorder %s2816_s1, %s3712_s11 }
  0x1f   :  { %p2822_p10 = pnand %p2820_p9, %p2817_p8 }
  0x21   :  { %2825 = shalt.err (!%p2822_p10)
}
  0x22   :  { %s2826_s9 = scalar_lea.vmem %s85_s27, 16  ;;  %s2830_s28 = scalar_lea.vmem %s85_s27, 32 }
  0x23   :  { %p2827_p11 = scmp.ne.s32.totalorder %s85_s27, %s2826_s9  ;;  %p2831_p12 = scmp.lt.s32.totalorder %s85_s27, %s85_s27 }
  0x24   :  { %p2832_p13 = scmp.lt.s32.totalorder %s2830_s28, %s2826_s9 }
  0x26   :  { %p2833_p0 = por %p2832_p13, %p2831_p12 }
  0x28   :  { %p2834_p1 = pnand %p2833_p0, %p2827_p11 }
  0x2a   :  { %2837 = shalt.err (!%p2834_p1)
}
  0x2b   :  { %87 = dma.hbm_to_vmem [thread:$0]  %s3712_s11, 16, %s85_s27, [#allocation9]  }
  0x2c   :  { %s2838_s18 = scalar_lea.hbm %s3716_s15, 32 }
  0x2d   :  { %p2839_p2 = scmp.ne.s32.totalorder %s3716_s15, %s2838_s18  ;;  %p2842_p3 = scmp.lt.u32.totalorder %s2838_s18, %s3716_s15 }
  0x2f   :  { %p2844_p4 = pnand %p2842_p3, %p2839_p2 }
  0x31   :  { %2847 = shalt.err (!%p2844_p4)
}
  0x32   :  { %s2848_s21 = scalar_lea.vmem %s109_s30, 32  ;;  %p2853_p6 = scmp.lt.s32.totalorder %s109_s30, %s109_s30 }
  0x33   :  { %p2849_p5 = scmp.ne.s32.totalorder %s109_s30, %s2848_s21  ;;  %p2854_p7 = scmp.lt.s32.totalorder %s2848_s21, %s2848_s21 }
  0x35   :  { %p2855_p8 = por %p2854_p7, %p2853_p6 }
  0x37   :  { %p2856_p9 = pnand %p2855_p8, %p2849_p5 }
  0x39   :  { %2859 = shalt.err (!%p2856_p9)
}
  0x3a   :  { %111 = dma.hbm_to_vmem [thread:$0]  %s3716_s15, 32, %s109_s30, [#allocation12]  }
  0x3b   :  { %s2985_s22 = smov [#allocation2]   ;;  %s2986_s28 = smov [#allocation7]  }
  0x3c   :  { %s48_s9 = sshll.u32 %s2985_s22, 4  ;;  %s71_s24 = sshll.u32 %s2986_s28, 4  ;;  %s49_s9 = int_to_ptr.vmem [resolvable:$true] %s48_s9  ;;  %s72_s24 = int_to_ptr.vmem [resolvable:$true] %s71_s24 }
  0x3d   :  { %s2860_s29 = scalar_lea.hbm %s3708_s7, 16 }
  0x3e   :  { %p2861_p10 = scmp.ne.s32.totalorder %s3708_s7, %s2860_s29  ;;  %p2864_p11 = scmp.lt.u32.totalorder %s2860_s29, %s3708_s7 }
  0x40   :  { %p2866_p12 = pnand %p2864_p11, %p2861_p10 }
  0x42   :  { %2869 = shalt.err (!%p2866_p12)
}
  0x43   :  { %s2870_s15 = scalar_lea.vmem %s49_s9, 16  ;;  %s2874_s30 = scalar_lea.vmem %s49_s9, 32 }
  0x44   :  { %p2871_p13 = scmp.ne.s32.totalorder %s49_s9, %s2870_s15  ;;  %p2875_p0 = scmp.lt.s32.totalorder %s49_s9, %s49_s9 }
  0x45   :  { %p2876_p1 = scmp.lt.s32.totalorder %s2874_s30, %s2870_s15 }
  0x47   :  { %p2877_p2 = por %p2876_p1, %p2875_p0 }
  0x49   :  { %p2878_p3 = pnand %p2877_p2, %p2871_p13 }
  0x4b   :  { %2881 = shalt.err (!%p2878_p3)
}
  0x4c   :  { %51 = dma.hbm_to_vmem [thread:$0]  %s3708_s7, 16, %s49_s9, [#allocation3]  }
  0x4d   :  { %s2882_s22 = scalar_lea.hbm %s3711_s10, 512 }
  0x4e   :  { %p2883_p4 = scmp.ne.s32.totalorder %s3711_s10, %s2882_s22  ;;  %p2886_p5 = scmp.lt.u32.totalorder %s2882_s22, %s3711_s10 }
  0x50   :  { %p2888_p6 = pnand %p2886_p5, %p2883_p4 }
  0x52   :  { %2891 = shalt.err (!%p2888_p6)
}
  0x53   :  { %s2892_s18 = scalar_lea.vmem %s72_s24, 512  ;;  %p2897_p8 = scmp.lt.s32.totalorder %s72_s24, %s72_s24 }
  0x54   :  { %p2893_p7 = scmp.ne.s32.totalorder %s72_s24, %s2892_s18  ;;  %p2898_p9 = scmp.lt.s32.totalorder %s2892_s18, %s2892_s18 }
  0x56   :  { %p2899_p10 = por %p2898_p9, %p2897_p8 }
  0x58   :  { %p2900_p11 = pnand %p2899_p10, %p2893_p7 }
  0x5a   :  { %2903 = shalt.err (!%p2900_p11)
}
  0x5b   :  { %77 = dma.hbm_to_vmem [thread:$0]  %s3711_s10, 512, %s72_s24, [#allocation6], %s2981_s2, %s2981_s2, %s2982_s23  }
  0x5c   :  { %s2987_s0 = smov [#allocation10]   ;;  %s2988_s1 = smov [#allocation13]  }
  0x5d   :  { %s96_s19 = sshll.u32 %s2987_s0, 4  ;;  %s120_s15 = sshll.u32 %s2988_s1, 4  ;;  %s97_s19 = int_to_ptr.vmem [resolvable:$true] %s96_s19  ;;  %s121_s15 = int_to_ptr.vmem [resolvable:$true] %s120_s15 }
  0x5e   :  { %s2904_s21 = scalar_lea.hbm %s3714_s13, 32 }
  0x5f   :  { %p2905_p12 = scmp.ne.s32.totalorder %s3714_s13, %s2904_s21  ;;  %p2908_p13 = scmp.lt.u32.totalorder %s2904_s21, %s3714_s13 }
  0x61   :  { %p2910_p0 = pnand %p2908_p13, %p2905_p12 }
  0x63   :  { %2913 = shalt.err (!%p2910_p0)
}
  0x64   :  { %s2914_s10 = scalar_lea.vmem %s97_s19, 32  ;;  %p2919_p2 = scmp.lt.s32.totalorder %s97_s19, %s97_s19 }
  0x65   :  { %p2915_p1 = scmp.ne.s32.totalorder %s97_s19, %s2914_s10  ;;  %p2920_p3 = scmp.lt.s32.totalorder %s2914_s10, %s2914_s10 }
  0x67   :  { %p2921_p4 = por %p2920_p3, %p2919_p2 }
  0x69   :  { %p2922_p5 = pnand %p2921_p4, %p2915_p1 }
  0x6b   :  { %2925 = shalt.err (!%p2922_p5)
}
  0x6c   :  { %99 = dma.hbm_to_vmem [thread:$0]  %s3714_s13, 32, %s97_s19, [#allocation9]  }
  0x6d   :  { %s2926_s18 = scalar_lea.hbm %s3718_s17, 16 }
  0x6e   :  { %p2927_p6 = scmp.ne.s32.totalorder %s3718_s17, %s2926_s18  ;;  %p2930_p7 = scmp.lt.u32.totalorder %s2926_s18, %s3718_s17 }
  0x70   :  { %p2932_p8 = pnand %p2930_p7, %p2927_p6 }
  0x72   :  { %2935 = shalt.err (!%p2932_p8)
}
  0x73   :  { %s2936_s30 = scalar_lea.vmem %s121_s15, 16  ;;  %s2940_s20 = scalar_lea.vmem %s121_s15, 32 }
  0x74   :  { %p2937_p9 = scmp.ne.s32.totalorder %s121_s15, %s2936_s30  ;;  %p2941_p10 = scmp.lt.s32.totalorder %s121_s15, %s121_s15 }
  0x75   :  { %p2942_p11 = scmp.lt.s32.totalorder %s2940_s20, %s2936_s30 }
  0x77   :  { %p2943_p12 = por %p2942_p11, %p2941_p10 }
  0x79   :  { %p2944_p13 = pnand %p2943_p12, %p2937_p9 }
  0x7b   :  { %2947 = shalt.err (!%p2944_p13)
}
  0x7c   :  { %123 = dma.hbm_to_vmem [thread:$0]  %s3718_s17, 16, %s121_s15, [#allocation12]  }
  0x7d   :  { %2970 = dma.done.wait [#allocation3], 16  }
  0x7e   :  { %2971 = vsyncadd [#allocation3], 4294967280 }
  0x7f   :  { %2972 = dma.done.wait [#allocation6], 1024  }
  0x80   :  { %2973 = vsyncadd [#allocation6], 4294966272 }
  0x81   :  { %2974 = dma.done.wait [#allocation9], 48  }
  0x82   :  { %2975 = vsyncadd [#allocation9], 4294967248 }
  0x83   :  { %2976 = dma.done.wait [#allocation12], 48  }
  0x84   :  { %2977 = vsyncadd [#allocation12], 4294967248  ;;  %v2989_v0 = vmov 0   ;;  %v2990_v1 = vmov 0.0|0.0   ;;  %vm2991_vm0 = vmmov 0   ;;  %v2992_v2 = vmov 0.0  }
  0x85   :  { %2689 = vset.pattern.permute.xlu0 %v2989_v0  ;;  %2470 = vmatprep.subr.bf16.mxu1 %v2990_v1  ;;  %s3727_s15 = sld [smem:[#allocation20_spill]]  ;;  %s3728_s22 = sld [smem:[#allocation21_spill]]  ;;  %v253_v13 = vld [vmem:[%s3704_s3] sm:$0xff]  ;;  %v254_v14 = vld [vmem:[%s3704_s3 + $0x8] sm:$0xff]  ;;  %v255_v16 = vld [vmem:[%s3704_s3 + $0x10] sm:$0xff]  ;;  %vm264_vm1 = vcmask 261120   ;;  %v147_v51 = vlaneseq }
  0x86   :  { %2350 = vmatprep.mubr.msk.f32.mxu1 %vm2991_vm0, %v2992_v2  ;;  %v2471_v15 = vpack.c.bf16 %v254_v14, %v253_v13  ;;  %v256_v17 = vld [vmem:[%s3704_s3 + $0x18] sm:$0xff]  ;;  %v338_v22 = vld [vmem:[%s3707_s6] sm:$0xff]  ;;  %v339_v23 = vld [vmem:[%s3707_s6 + $0x8] sm:$0xff]  ;;  %s3729_s30 = sld [smem:[#allocation22_spill]]  ;;  %v2993_v54 = vmov 1.0   ;;  %vm353_vm4 = vcmask 523264  }
  0x87   :  { %v2474_v19 = vpack.c.bf16 %v256_v17, %v255_v16  ;;  %v2477_v27 = vpack.c.bf16 %v339_v23, %v338_v22  ;;  %v340_v29 = vld [vmem:[%s3707_s6 + $0x10] sm:$0xff]  ;;  %v341_v30 = vld [vmem:[%s3707_s6 + $0x18] sm:$0xff]  ;;  %v342_v35 = vld [vmem:[%s3707_s6 + $0x20] sm:$0xff]  ;;  %v148_v52 = vand.u32 127, %v147_v51  ;;  %vm547_vm5 = vcmask 130048  }
  0x88   :  { %2472 = vmatpush3.bf16.msra.mxu1 %v2471_v15  ;;  %v2480_v33 = vpack.c.bf16 %v341_v30, %v340_v29  ;;  %v343_v36 = vld [vmem:[%s3707_s6 + $0x28] sm:$0xff]  ;;  %v344_v45 = vld [vmem:[%s3707_s6 + $0x30] sm:$0xff]  ;;  %v345_v46 = vld [vmem:[%s3707_s6 + $0x38] sm:$0xff]  ;;  %vm1149_vm6 = vcmask 1041409   ;;  %vm2052_vm7 = vcmask 1040384   ;;  %vm2055_vm8 = vcmask 1041408  }
  0x89   :  { %2473 = vmatprep.subr.bf16.mxu1 %v2990_v1  ;;  %v2483_v38 = vpack.c.bf16 %v343_v36, %v342_v35  ;;  %v2486_v47 = vpack.c.bf16 %v345_v46, %v344_v45  ;;  %v427_v48 = vld [vmem:[%s3706_s5] sm:$0xff]  ;;  %v428_v49 = vld [vmem:[%s3706_s5 + $0x8] sm:$0xff]  ;;  %v429_v57 = vld [vmem:[%s3706_s5 + $0x10] sm:$0xff]  ;;  %vm2058_vm9 = vcmask 1042432   ;;  %vm2061_vm10 = vcmask 1043456  }
  0x8a   :  { %v2488_v50 = vpack.c.bf16 %v428_v49, %v427_v48  ;;  %v2199_v56 = vld [vmem:[%s3705_s4] ss:$0 sm:$0xff]  ;;  %v430_v58 = vld [vmem:[%s3706_s5 + $0x18] sm:$0xff]  ;;  %s2995_s4 = smov 64   ;;  %vm2064_vm11 = vcmask 1044480   ;;  %vm2067_vm12 = vcmask 1045504  }
  0x8b   :  { %v145_v3 = vld [vmem:[%s3727_s15] sm:$0xff]  ;;  %v162_v5 = vld [vmem:[%s3728_s22 + $0x8] sm:$0xff]  ;;  %v163_v6 = vld [vmem:[%s3728_s22 + $0x10] sm:$0xff]  ;;  %v2492_v62 = vpack.c.bf16 %v430_v58, %v429_v57  ;;  %vm2070_vm13 = vcmask 1046528  }
  0x8c   :  { %v161_v4 = vld [vmem:[%s3728_s22] sm:$0xff]  ;;  %150 = vperm.xlu0 %2689, %v145_v3   ;;  %v164_v7 = vld [vmem:[%s3728_s22 + $0x18] sm:$0xff]  ;;  %v146_v8 = vld [vmem:[%s3727_s15 + $0x8] sm:$0xff]  ;;  %2475 = vmatpush3.bf16.msra.mxu1 %v2474_v19 }
  0x8d   :  { %v2438_v9 = vpack.c.bf16 %v162_v5, %v161_v4  ;;  %v2442_v10 = vpack.c.bf16 %v164_v7, %v163_v6  ;;  %v165_v11 = vld [vmem:[%s3728_s22 + $0x20] sm:$0xff]  ;;  %v166_v12 = vld [vmem:[%s3728_s22 + $0x28] sm:$0xff]  ;;  %v167_v20 = vld [vmem:[%s3728_s22 + $0x30] sm:$0xff]  ;;  %2476 = vmatprep.subr.bf16.mxu1 %v2990_v1  ;;  %v2994_v5 = vmov 1966171168   ;;  %v3317_v7 = vshrl.u32 %v147_v51, 7 }
  0x8e   :  { %v2446_v18 = vpack.c.bf16 %v166_v12, %v165_v11  ;;  %v168_v21 = vld [vmem:[%s3728_s22 + $0x38] sm:$0xff]  ;;  %v169_v25 = vld [vmem:[%s3728_s22 + $0x40] sm:$0xff]  ;;  %v170_v28 = vld [vmem:[%s3728_s22 + $0x48] sm:$0xff]  ;;  %v514_v6 = vunpack.c.l.s4 %v2994_v5 }
  0x8f   :  { %2439 = vmatprep.subr.bf16.mxu0 %v2438_v9  ;;  %v2450_v24 = vpack.c.bf16 %v168_v21, %v167_v20  ;;  %v252_v26 = vld [vmem:[%s3729_s30] sm:$0x3]  ;;  %v2454_v31 = vpack.c.bf16 %v170_v28, %v169_v25  ;;  %v171_v32 = vld [vmem:[%s3728_s22 + $0x50] sm:$0xff]  ;;  %v172_v34 = vld [vmem:[%s3728_s22 + $0x58] sm:$0xff]  ;;  %v3321_v15 = vsub.s32 0, %v3317_v7 }
  0x90   :  { %153 = vperm.xlu0 %2689, %v146_v8   ;;  %2441 = vmatpush3.bf16.msra.mxu0 %v2438_v9  ;;  %v2458_v37 = vpack.c.bf16 %v172_v34, %v171_v32  ;;  %v173_v39 = vld [vmem:[%s3728_s22 + $0x60] sm:$0xff]  ;;  %v174_v40 = vld [vmem:[%s3728_s22 + $0x68] sm:$0xff]  ;;  %v175_v42 = vld [vmem:[%s3728_s22 + $0x70] sm:$0xff]  ;;  %v515_v8 = vunpack.c.0.s8 %v514_v6 }
  0x91   :  { %2443 = vmatprep.subr.bf16.mxu0 %v2442_v10  ;;  %2351 = vmatmul.mubr.msk.f32.vlgmr.msra.gmra.mrb[0].mxu1 %vm264_vm1, %v252_v26  ;;  %v2462_v41 = vpack.c.bf16 %v174_v40, %v173_v39  ;;  %v176_v43 = vld [vmem:[%s3728_s22 + $0x78] sm:$0xff]  ;;  %v2201_v9 = vld [vmem:[#allocation2] ss:$0 sm:$0xff] }
  0x92   :  { %2478 = vmatpush3.bf16.msra.mxu1 %v2477_v27  ;;  %2369 = vmatprep.mubr.msk.f32.mxu1 %vm2991_vm0, %v2992_v2  ;;  %v2466_v44 = vpack.c.bf16 %v176_v43, %v175_v42  ;;  %v518_v11 = vsub.s32 %v515_v8, %v3317_v7  ;;  %v570_v36 = vld [vmem:[%s3709_s8] sm:$0xff]  ;;  %v573_v42 = vld [vmem:[%s3709_s8 + $0x18] sm:$0xff] }
  0x93   :  { %2479 = vmatprep.subr.bf16.mxu1 %v2990_v1  ;;  %v724_v43 = vld [vmem:[#allocation7] sm:$0xff]  ;;  %v727_v51 = vld [vmem:[#allocation7 + $0x18] sm:$0xff]  ;;  %v722_v8 = vld [vmem:[#allocation5 + $0x10] sm:$0xff] }
  0x94   :  { %2445 = vmatpush3.bf16.msra.mxu0 %v2442_v10  ;;  %v896_v57 = vld [vmem:[%s3713_s12 + $0x18] sm:$0xff]  ;;  %v893_v58 = vld [vmem:[%s3713_s12] sm:$0xff] }
  0x95   :  { %2447 = vmatprep.subr.bf16.mxu0 %v2446_v18 }
  0x96   :  { %2481 = vmatpush3.bf16.msra.mxu1 %v2480_v33 }
  0x97   :  { %2482 = vmatprep.subr.bf16.mxu1 %v2990_v1 }
  0x98   :  { %2449 = vmatpush3.bf16.msra.mxu0 %v2446_v18 }
  0x99   :  { %2451 = vmatprep.subr.bf16.mxu0 %v2450_v24 }
  0x9a   :  { %2484 = vmatpush3.bf16.msra.mxu1 %v2483_v38 }
  0x9b   :  { %2485 = vmatprep.subr.bf16.mxu1 %v2990_v1 }
  0x9c   :  { %2453 = vmatpush3.bf16.msra.mxu0 %v2450_v24 }
  0x9d   :  { %2455 = vmatprep.subr.bf16.mxu0 %v2454_v31 }
  0x9e   :  { %2487 = vmatpush3.bf16.msra.mxu1 %v2486_v47 }
  0x9f   :  { %2489 = vmatprep.subr.bf16.mxu1 %v2488_v50 }
  0xa0   :  { %2457 = vmatpush3.bf16.msra.mxu0 %v2454_v31 }
  0xa1   :  { %2459 = vmatprep.subr.bf16.mxu0 %v2458_v37 }
  0xa4   :  { %2461 = vmatpush3.bf16.msra.mxu0 %v2458_v37  ;;  %v571_v37 = vld [vmem:[%s3709_s8 + $0x8] sm:$0xff] }
  0xa5   :  { %2463 = vmatprep.subr.bf16.mxu0 %v2462_v41  ;;  %v2497_v38 = vpack.c.bf16 %v571_v37, %v570_v36  ;;  %v1008_v37 = vld [vmem:[%s3715_s14 + $0x60] sm:$0xff] }
  0xa8   :  { %2465 = vmatpush3.bf16.msra.mxu0 %v2462_v41  ;;  %v572_v41 = vld [vmem:[%s3709_s8 + $0x10] sm:$0xff] }
  0xa9   :  { %2467 = vmatprep.subr.bf16.mxu0 %v2466_v44  ;;  %v2500_v46 = vpack.c.bf16 %v573_v42, %v572_v41 }
  0xac   :  { %2469 = vmatpush3.bf16.msra.mxu0 %v2466_v44  ;;  %v725_v44 = vld [vmem:[#allocation7 + $0x8] sm:$0xff] }
  0xad   :  { %2496 = vmatprep.subr.bf16.mxu0 %v2990_v1  ;;  %v2502_v48 = vpack.c.bf16 %v725_v44, %v724_v43 }
 0x10b   :  { %v151_v53 = vpop.permute.xlu0 %150 }
 0x10c   :  { %vm155_vm2 = vcmp.eq.s32.totalorder %v148_v52, %v151_v53  ;;  %v720_v53 = vld [vmem:[#allocation5] sm:$0xff] }
 0x10d   :  { %2339 = vmatprep.mubr.msk.f32.mxu0 %vm155_vm2, %v2993_v54 }
 0x10f   :  { %v154_v55 = vpop.permute.xlu0 %153 }
 0x110   :  { %vm156_vm3 = vcmp.eq.s32.totalorder %v148_v52, %v154_v55 }
 0x111   :  { %2340 = vmatmul.mubr.msk.f32.vlgmr.msra.gmra.mrb[0].mxu0 %vm156_vm3, %v2993_v54  ;;  %v721_v54 = vld [vmem:[#allocation5 + $0x8] sm:$0xff] }
 0x112   :  { %2387 = vmatprep.mubr.msk.f32.mxu0 %vm2991_vm0, %v2992_v2  ;;  %2498 = vmatpush3.bf16.msra.mxu0 %v2497_v38  ;;  %v2510_v55 = vpack.c.bf16 %v721_v54, %v720_v53  ;;  %v1010_v38 = vld [vmem:[%s3715_s14 + $0x70] sm:$0xff] }
 0x113   :  { %2499 = vmatprep.subr.bf16.mxu0 %v2990_v1 }
 0x164   :  { %v334_v59 = vpop.f32.mrb[0].mxu1 }
 0x165   :  { %v3304_v60 = vadd.f32 %v2199_v56, %v334_v59  ;;  %v2352_v61 = vpop.f32.mrb[1].mxu1  ;;  %v894_v56 = vld [vmem:[%s3713_s12 + $0x8] sm:$0xff] }
 0x166   :  { %v2518_v59 = vpack.c.bf16 %v896_v57, %v894_v56  ;;  %v895_v61 = vld [vmem:[%s3713_s12 + $0x10] sm:$0xff] }
 0x167   :  { %2370 = vmatmul.mubr.msk.f32.vlgmr.msra.gmra.mrb[2].mxu1 %vm353_vm4, %v3304_v60  ;;  %v1135_v35 = vrot.slane %v3304_v60, 1 }
 0x168   :  { %2491 = vmatpush3.bf16.msra.mxu1 %v2488_v50  ;;  %v726_v50 = vld [vmem:[#allocation7 + $0x10] sm:$0xff] }
 0x169   :  { %2493 = vmatprep.subr.bf16.mxu1 %v2492_v62  ;;  %v2506_v52 = vpack.c.bf16 %v727_v51, %v726_v50 }
 0x16c   :  { %2495 = vmatpush3.bf16.msra.mxu1 %v2492_v62  ;;  %v898_v62 = vld [vmem:[%s3713_s12 + $0x28] sm:$0xff] }
 0x16d   :  { %2519 = vmatprep.subr.bf16.mxu1 %v2518_v59 }
 0x1e4   :  { %v3308_v63 = vpop.f32.mrb[0].mxu0 }
 0x1e5   :  { %v3310_v0 = vpop.f32.mrb[1].mxu0 }
 0x1e6   :  { %2380 = vmatprep.mubr.msk.f32.mxu1 %vm264_vm1, %v3310_v0 }
 0x1e7   :  { %2381 = vmatmul.mubr.msk.f32.vlgmr.msra.gmra.mrb[4].mxu1 %vm264_vm1, %v3308_v63 }
 0x1e8   :  { %983 = vmatprep.mubr.f32.mxu1 %v2992_v2 }
 0x23a   :  { %v423_v3 = vpop.f32.mrb[2].mxu1 }
 0x23b   :  { %v2371_v4 = vpop.f32.mrb[3].mxu1  ;;  %v424_v10 = vadd.f32 %v2201_v9, %v423_v3  ;;  %v900_v3 = vld [vmem:[%s3713_s12 + $0x38] sm:$0xff] }
 0x23c   :  { %v2520_v4 = vpack.c.bf16 %v895_v61, %v893_v58  ;;  %v2522_v5 = vpack.c.bf16 %v900_v3, %v898_v62  ;;  %v723_v9 = vld [vmem:[#allocation5 + $0x18] sm:$0xff] }
 0x23d   :  { %v519_v12 = vrot.slane %v424_v10, %v518_v11 }
 0x23e   :  { %2521 = vmatpush1.bf16.msra.mxu1 %v2520_v4 }
 0x23f   :  { %v520_v13 = vcombine.high %v519_v12, %v519_v12  ;;  %v527_v16 = vrot.slane %v519_v12, %v518_v11  ;;  %2523 = vmatprep.subr.bf16.mxu1 %v2522_v5 }
 0x241   :  { %v534_v14 = vrot.slane %v520_v13, %v518_v11  ;;  %v538_v18 = vrot.slane %v527_v16, %v3321_v15  ;;  %v2514_v11 = vpack.c.bf16 %v723_v9, %v722_v8  ;;  %v899_v16 = vld [vmem:[%s3713_s12 + $0x30] sm:$0xff] }
 0x243   :  { %v542_v17 = vrot.slane %v534_v14, %v3321_v15  ;;  %v897_v14 = vld [vmem:[%s3713_s12 + $0x20] sm:$0xff] }
 0x2ba   :  { %v2382_v19 = vpop.f32.mrb[4].mxu1 }
 0x2bb   :  { %v546_v20 = vadd.f32 %v2382_v19, %v542_v17  ;;  %v503_v21 = vpop.f32.mrb[5].mxu1  ;;  %v2524_v17 = vpack.c.bf16 %v899_v16, %v897_v14  ;;  %v996_v19 = vld [vmem:[%s3715_s14] sm:$0xff] }
 0x2bc   :  { %v545_v22 = vadd.f32 %v538_v18, %v503_v21 }
 0x2bd   :  { %v551_v24 = vsel %vm547_vm5, %v546_v20, -inf  ;;  %2525 = vmatpush1.bf16.msra.mxu1 %v2524_v17 }
 0x2be   :  { %v548_v23 = vsel %vm547_vm5, %v545_v22, -inf }
 0x2bf   :  { %549 = vmax.xlane.f32.xlu1 %v548_v23  ;;  %v1003_v23 = vld [vmem:[%s3715_s14 + $0x38] sm:$0xff] }
 0x2c3   :  { %552 = vmax.xlane.f32.xlu1 %v551_v24 }
 0x34c   :  { %v550_v25 = vpop.xlane.xlu1 %549 }
 0x34d   :  { %v554_v26 = vsub.f32 %v545_v22, %v550_v25  ;;  %v1001_v22 = vld [vmem:[%s3715_s14 + $0x28] sm:$0xff]  ;;  %v1000_v25 = vld [vmem:[%s3715_s14 + $0x20] sm:$0xff] }
 0x34e   :  { %v3404_v24 = vpack.c.bf16 %v1003_v23, %v1001_v22 }
 0x34f   :  { %v556_v27 = vmul.f32 1.442695, %v554_v26  ;;  %v1002_v26 = vld [vmem:[%s3715_s14 + $0x30] sm:$0xff] }
 0x350   :  { %v553_v28 = vpop.xlane.xlu1 %552 }
 0x351   :  { %2690 = vpow2.f32 %v556_v27  ;;  %v555_v29 = vsub.f32 %v546_v20, %v553_v28  ;;  %v998_v20 = vld [vmem:[%s3715_s14 + $0x10] sm:$0xff]  ;;  %v3412_v27 = vpack.c.bf16 %v1002_v26, %v1000_v25  ;;  %v1005_v28 = vld [vmem:[%s3715_s14 + $0x48] sm:$0xff] }
 0x352   :  { %v3393_v21 = vpack.c.bf16 %v998_v20, %v996_v19 }
 0x353   :  { %v558_v30 = vmul.f32 1.442695, %v555_v29  ;;  %v1007_v29 = vld [vmem:[%s3715_s14 + $0x58] sm:$0xff] }
 0x355   :  { %2692 = vpow2.f32 %v558_v30  ;;  %v3422_v30 = vpack.c.bf16 %v1007_v29, %v1005_v28 }
 0x35b   :  { %v2691_v31 = vpop.eup %2690 }
 0x35c   :  { %v560_v32 = vsel %vm547_vm5, %v2691_v31, 0.0 }
 0x35d   :  { %561 = vadd.xlane.f32.xlu0 %v560_v32  ;;  %v1006_v32 = vld [vmem:[%s3715_s14 + $0x50] sm:$0xff] }
 0x35f   :  { %v2693_v33 = vpop.eup %2692 }
 0x360   :  { %v563_v34 = vsel %vm547_vm5, %v2693_v33, 0.0 }
 0x361   :  { %564 = vadd.xlane.f32.xlu1 %v563_v34  ;;  %v1009_v34 = vld [vmem:[%s3715_s14 + $0x68] sm:$0xff] }
 0x372   :  { %1138 = vrot.lane.b32.xlu1 %v1135_v35, %s2995_s4  ;;  %v1011_v35 = vld [vmem:[%s3715_s14 + $0x78] sm:$0xff] }
 0x373   :  { %v3440_v36 = vpack.c.bf16 %v1011_v35, %v1009_v34 }
 0x3ea   :  { %v562_v39 = vpop.xlane.xlu0 %561 }
 0x3eb   :  { %2694 = vrcp.f32 %v562_v39  ;;  %v3448_v39 = vpack.c.bf16 %v1010_v38, %v1008_v37 }
 0x3ee   :  { %v565_v40 = vpop.xlane.xlu1 %564 }
 0x3ef   :  { %2696 = vrcp.f32 %v565_v40  ;;  %v2211_v40 = vld [vmem:[#allocation8] ss:$0 sm:$0xff] }
 0x3f2   :  { %v1139_v22 = vpop.permute.xlu1 %1138 }
 0x3f5   :  { %v2695_v45 = vpop.eup %2694 }
 0x3f6   :  { %v567_v47 = vmul.f32 %v2695_v45, %v2691_v31  ;;  %v1004_v31 = vld [vmem:[%s3715_s14 + $0x40] sm:$0xff] }
 0x3f8   :  { %2388 = vmatmul.mubr.msk.f32.vlgmr.msra.gmra.mrb[2].mxu0 %vm547_vm5, %v567_v47 }
 0x3f9   :  { %v2697_v1 = vpop.eup %2696  ;;  %2501 = vmatpush3.bf16.msra.mxu0 %v2500_v46  ;;  %2394 = vmatprep.mubr.msk.f32.mxu0 %vm2991_vm0, %v2992_v2 }
 0x3fa   :  { %v569_v49 = vmul.f32 %v2697_v1, %v2693_v33  ;;  %2503 = vmatprep.subr.bf16.mxu0 %v2502_v48  ;;  %v3430_v33 = vpack.c.bf16 %v1006_v32, %v1004_v31  ;;  %v901_v1 = vld [vmem:[#allocation10] sm:$0x3] }
 0x3fb   :  { %v906_v50 = vrot.slane %v901_v1, %v3321_v15 }
 0x3fc   :  { %2395 = vmatmul.mubr.msk.f32.vlgmr.msra.gmra.mrb[4].mxu0 %vm547_vm5, %v569_v49  ;;  %v1012_v49 = vld [vmem:[#allocation11] sm:$0x3] }
 0x3fd   :  { %2505 = vmatpush3.bf16.msra.mxu0 %v2502_v48  ;;  %v3478_v51 = vrot.slane %v1012_v49, %v3321_v15 }
 0x3fe   :  { %2507 = vmatprep.subr.bf16.mxu0 %v2506_v52 }
 0x401   :  { %2509 = vmatpush3.bf16.msra.mxu0 %v2506_v52 }
 0x402   :  { %2511 = vmatprep.subr.bf16.mxu0 %v2510_v55 }
 0x4cb   :  { %v643_v6 = vpop.f32.mrb[2].mxu0 }
 0x4cc   :  { %v2389_v10 = vpop.f32.mrb[3].mxu0  ;;  %2405 = vmatprep.mubr.msk.f32.mxu0 %vm264_vm1, %v643_v6  ;;  %v909_v6 = vsub.s32 1, %v3317_v7 }
 0x4ce   :  { %v3488_v8 = vrot.slane %v1012_v49, %v909_v6  ;;  %v910_v9 = vrot.slane %v901_v1, %v909_v6 }
 0x4cf   :  { %v716_v12 = vpop.f32.mrb[4].mxu0 }
 0x4d0   :  { %v2396_v13 = vpop.f32.mrb[5].mxu0  ;;  %2406 = vmatmul.mubr.msk.f32.vlgmr.msra.gmra.mrb[6].mxu0 %vm264_vm1, %v716_v12 }
 0x4d1   :  { %2513 = vmatpush3.bf16.msra.mxu0 %v2510_v55  ;;  %2416 = vmatprep.mubr.msk.f32.mxu0 %vm264_vm1, %v3310_v0  ;;  %v997_v0 = vld [vmem:[%s3715_s14 + $0x8] sm:$0xff] }
 0x4d2   :  { %2515 = vmatprep.subr.bf16.mxu0 %v2514_v11 }
 0x4d5   :  { %2517 = vmatpush3.bf16.msra.mxu0 %v2514_v11 }
 0x4d8   :  { %2417 = vmatmul.mubr.msk.f32.vlgmr.msra.gmra.mrb[6].mxu0 %vm264_vm1, %v3308_v63  ;;  %v999_v63 = vld [vmem:[%s3715_s14 + $0x18] sm:$0xff] }
 0x4d9   :  { %1219 = vmatprep.mubr.f32.mxu0 %v2992_v2  ;;  %v3385_v18 = vpack.c.bf16 %v999_v63, %v997_v0 }
 0x4db   :  { %2527 = vmatprep.subr.bf16.mxu1 %v3385_v18  ;;  %2543 = vmatprep.subr.bf16.mxu0 %v3385_v18 }
 0x4dc   :  { %2545 = vmatpush1.bf16.msra.mxu0 %v3393_v21 }
 0x4dd   :  { %2547 = vmatprep.subr.bf16.mxu0 %v3404_v24 }
 0x4e0   :  { %2549 = vmatpush1.bf16.msra.mxu0 %v3412_v27 }
 0x4e1   :  { %2551 = vmatprep.subr.bf16.mxu0 %v3422_v30 }
 0x4e4   :  { %2553 = vmatpush1.bf16.msra.mxu0 %v3430_v33 }
 0x4e5   :  { %2555 = vmatprep.subr.bf16.mxu0 %v3440_v36 }
 0x4e8   :  { %2557 = vmatpush1.bf16.msra.mxu0 %v3448_v39 }
 0x4e9   :  { %2575 = vmatprep.subr.bf16.mxu0 %v3385_v18 }
 0x5ab   :  { %v2418_v41 = vpop.f32.mrb[6].mxu0 }
 0x5ac   :  { %v875_v42 = vpop.f32.mrb[7].mxu0  ;;  %v892_v44 = vadd.f32 %v2418_v41, %v2211_v40 }
 0x5ad   :  { %v891_v43 = vadd.f32 %v2211_v40, %v875_v42 }
 0x5af   :  { %2212 = vmatmul.mubr.msk.f32.vlgmr.msra.gmra.mrb[6].mxu1 %vm264_vm1, %v891_v43 }
 0x5b0   :  { %2529 = vmatpush1.bf16.msra.mxu1 %v3393_v21  ;;  %989 = vmatprep.mubr.f32.mxu1 %v2992_v2 }
 0x5b1   :  { %2531 = vmatprep.subr.bf16.mxu1 %v3404_v24 }
 0x5b3   :  { %2213 = vmatmul.mubr.msk.f32.gmra.mrb[8].mxu1 %vm264_vm1, %v892_v44 }
 0x5b4   :  { %2533 = vmatpush1.bf16.msra.mxu1 %v3412_v27  ;;  %1088 = vmatprep.mubr.f32.mxu1 %v2992_v2 }
 0x5b5   :  { %2535 = vmatprep.subr.bf16.mxu1 %v3422_v30 }
 0x5b8   :  { %2537 = vmatpush1.bf16.msra.mxu1 %v3430_v33 }
 0x5b9   :  { %2539 = vmatprep.subr.bf16.mxu1 %v3440_v36 }
 0x5bc   :  { %2541 = vmatpush1.bf16.msra.mxu1 %v3448_v39 }
 0x5bd   :  { %2559 = vmatprep.subr.bf16.mxu1 %v3385_v18 }
 0x5bf   :  { %2214 = vmatmul.mubr.msk.f32.vlgmr.msra.gmra.mrb[10].mxu1 %vm353_vm4, %v3304_v60 }
 0x5c0   :  { %2561 = vmatpush1.bf16.msra.mxu1 %v3393_v21  ;;  %1345 = vmatprep.mubr.f32.mxu1 %v2992_v2 }
 0x5c1   :  { %2563 = vmatprep.subr.bf16.mxu1 %v3404_v24 }
 0x5c4   :  { %2565 = vmatpush1.bf16.msra.mxu1 %v3412_v27 }
 0x5c5   :  { %2567 = vmatprep.subr.bf16.mxu1 %v3422_v30 }
 0x5c8   :  { %2569 = vmatpush1.bf16.msra.mxu1 %v3430_v33 }
 0x5c9   :  { %2571 = vmatprep.subr.bf16.mxu1 %v3440_v36 }
 0x5cc   :  { %2573 = vmatpush1.bf16.msra.mxu1 %v3448_v39 }
 0x5cd   :  { %2591 = vmatprep.subr.bf16.mxu1 %v3385_v18 }
 0x682   :  { %v985_v45 = vpop.f32.mrb[6].mxu1 }
 0x683   :  { %v987_v46 = vpop.f32.mrb[7].mxu1  ;;  %v3480_v53 = vadd.f32 %v985_v45, %v906_v50 }
 0x684   :  { %v3491_v12 = vadd.f32 %v987_v46, %v910_v9 }
 0x686   :  { %v991_v47 = vpop.f32.mrb[8].mxu1 }
 0x687   :  { %v993_v48 = vpop.f32.mrb[9].mxu1  ;;  %v3483_v56 = vadd.f32 %v991_v47, %v906_v50 }
 0x688   :  { %v3493_v17 = vadd.f32 %v993_v48, %v910_v9 }
 0x692   :  { %v1090_v52 = vpop.f32.mrb[10].mxu1 }
 0x693   :  { %v1091_v54 = vadd.f32 %v1090_v52, %v3478_v51  ;;  %v1092_v55 = vpop.f32.mrb[11].mxu1 }
 0x694   :  { %v1093_v10 = vadd.f32 %v1092_v55, %v3488_v8 }
 0x695   :  { %v1096_v57 = vrot.slane %v1091_v54, 1  ;;  %v1099_v58 = vadd.f32 %v1091_v54, %v3480_v53 }
 0x696   :  { %v1114_v13 = vrot.slane %v1093_v10, 1 }
 0x697   :  { %v1100_v59 = vadd.f32 %v1096_v57, %v3483_v56  ;;  %v2215_v61 = vmul.f32 -1.442695, %v1099_v58 }
 0x699   :  { %2698 = vpow2.f32 %v2215_v61  ;;  %v2216_v62 = vmul.f32 -1.442695, %v1100_v59 }
 0x69b   :  { %2700 = vpow2.f32 %v2216_v62 }
 0x6a3   :  { %v2699_v3 = vpop.eup %2698 }
 0x6a4   :  { %v1107_v15 = vadd.f32 1.0, %v2699_v3 }
 0x6a5   :  { %v2701_v4 = vpop.eup %2700 }
 0x6a6   :  { %v1108_v5 = vadd.f32 1.0, %v2701_v4  ;;  %2702 = vrcp.f32 %v1107_v15 }
 0x6a8   :  { %2704 = vrcp.f32 %v1108_v5 }
 0x6b0   :  { %v2703_v11 = vpop.eup %2702 }
 0x6b1   :  { %v1117_v14 = vmul.f32 %v2703_v11, %v1093_v10  ;;  %v1123_v31 = vsub.f32 1.0, %v2703_v11 }
 0x6b2   :  { %v2705_v16 = vpop.eup %2704 }
 0x6b3   :  { %v1118_v0 = vmul.f32 %v2705_v16, %v1114_v13  ;;  %v1119_v63 = vadd.f32 %v1117_v14, %v3491_v12  ;;  %v1124_v25 = vsub.f32 1.0, %v2705_v16  ;;  %v1143_v28 = vmul.f32 %v2705_v16, %v1139_v22 }
 0x6b5   :  { %v1120_v19 = vadd.f32 %v1118_v0, %v3493_v17  ;;  %2706 = vtanh.f32 %v1119_v63 }
 0x6b7   :  { %2708 = vtanh.f32 %v1120_v19 }
 0x6bf   :  { %v2707_v7 = vpop.eup %2706 }
 0x6c0   :  { %1127 = vrot.lane.b32.xlu1 %v2707_v7, %s2995_s4 }
 0x6c1   :  { %v2709_v20 = vpop.eup %2708 }
 0x6c4   :  { %1129 = vrot.lane.b32.xlu1 %v2709_v20, %s2995_s4 }
 0x6c8   :  { %1136 = vrot.lane.b32.xlu1 %v3304_v60, %s2995_s4 }
 0x732   :  { %v1128_v23 = vpop.permute.xlu1 %1127 }
 0x733   :  { %v1133_v35 = vmul.f32 %v1128_v23, %v1123_v31 }
 0x736   :  { %v1130_v26 = vpop.permute.xlu1 %1129 }
 0x737   :  { %v1134_v29 = vmul.f32 %v1130_v26, %v1124_v25 }
 0x739   :  { %v3501_v32 = vadd.f32 %v1143_v28, %v1134_v29 }
 0x73a   :  { %v1137_v34 = vpop.permute.xlu1 %1136 }
 0x73b   :  { %v1142_v37 = vmul.f32 %v2703_v11, %v1137_v34  ;;  %v1148_v38 = vrot.slane %v3501_v32, 7 }
 0x73d   :  { %v3504_v40 = vadd.f32 %v1142_v37, %v1133_v35 }
 0x73f   :  { %v1150_v60 = vsel %vm1149_vm6, %v1148_v38, %v3504_v40  ;;  %v1266_v9 = vrot.slane %v3504_v40, 7 }
 0x740   :  { %1151 = vrot.lane.b32.xlu0 %v1150_v60, %s2995_s4 }
 0x7b2   :  { %v1152_v41 = vpop.permute.xlu0 %1151 }
 0x7b3   :  { %2217 = vmatmul.mubr.msk.f32.vlgmr.msra.gmra.mrb[8].mxu0 %vm353_vm4, %v1152_v41 }
 0x7b4   :  { %2577 = vmatpush1.bf16.msra.mxu0 %v3393_v21  ;;  %1475 = vmatprep.mubr.f32.mxu0 %v2992_v2 }
 0x7b5   :  { %2579 = vmatprep.subr.bf16.mxu0 %v3404_v24 }
 0x7b8   :  { %2581 = vmatpush1.bf16.msra.mxu0 %v3412_v27 }
 0x7b9   :  { %2583 = vmatprep.subr.bf16.mxu0 %v3422_v30 }
 0x7bc   :  { %2585 = vmatpush1.bf16.msra.mxu0 %v3430_v33 }
 0x7bd   :  { %2587 = vmatprep.subr.bf16.mxu0 %v3440_v36 }
 0x7c0   :  { %2589 = vmatpush1.bf16.msra.mxu0 %v3448_v39 }
 0x7c1   :  { %2607 = vmatprep.subr.bf16.mxu0 %v3385_v18 }
 0x886   :  { %v1221_v42 = vpop.f32.mrb[8].mxu0 }
 0x887   :  { %v1222_v43 = vadd.f32 %v1221_v42, %v3478_v51  ;;  %v1223_v44 = vpop.f32.mrb[9].mxu0 }
 0x888   :  { %v1224_v55 = vadd.f32 %v1223_v44, %v3488_v8 }
 0x889   :  { %v1227_v45 = vrot.slane %v1222_v43, 7  ;;  %v1231_v46 = vadd.f32 %v1222_v43, %v3483_v56 }
 0x88a   :  { %v1245_v58 = vrot.slane %v1224_v55, 7 }
 0x88b   :  { %v1230_v47 = vadd.f32 %v1227_v45, %v3480_v53  ;;  %v2219_v48 = vmul.f32 -1.442695, %v1231_v46 }
 0x88d   :  { %v2218_v1 = vmul.f32 -1.442695, %v1230_v47  ;;  %2710 = vpow2.f32 %v2219_v48 }
 0x88f   :  { %2712 = vpow2.f32 %v2218_v1 }
 0x897   :  { %v2711_v49 = vpop.eup %2710 }
 0x898   :  { %v1239_v50 = vadd.f32 1.0, %v2711_v49 }
 0x899   :  { %v2713_v52 = vpop.eup %2712 }
 0x89a   :  { %v1238_v54 = vadd.f32 1.0, %v2713_v52  ;;  %2714 = vrcp.f32 %v1239_v50 }
 0x89c   :  { %2716 = vrcp.f32 %v1238_v54 }
 0x8a4   :  { %v2715_v57 = vpop.eup %2714 }
 0x8a5   :  { %v1249_v59 = vmul.f32 %v2715_v57, %v1224_v55  ;;  %v1255_v16 = vsub.f32 1.0, %v2715_v57  ;;  %v1270_v63 = vmul.f32 %v2715_v57, %v1148_v38 }
 0x8a6   :  { %v2717_v61 = vpop.eup %2716 }
 0x8a7   :  { %v1248_v62 = vmul.f32 %v2717_v61, %v1245_v58  ;;  %v1251_v15 = vadd.f32 %v1249_v59, %v3493_v17  ;;  %v1254_v6 = vsub.f32 1.0, %v2717_v61  ;;  %v1269_v11 = vmul.f32 %v2717_v61, %v1266_v9 }
 0x8a9   :  { %v1250_v3 = vadd.f32 %v1248_v62, %v3491_v12 }
 0x8ab   :  { %2718 = vtanh.f32 %v1250_v3 }
 0x8ac   :  { %2720 = vtanh.f32 %v1251_v15 }
 0x8b5   :  { %v2719_v4 = vpop.eup %2718 }
 0x8b6   :  { %1258 = vrot.lane.b32.xlu1 %v2719_v4, %s2995_s4  ;;  %v2721_v5 = vpop.eup %2720 }
 0x8ba   :  { %1260 = vrot.lane.b32.xlu1 %v2721_v5, %s2995_s4 }
 0x928   :  { %v1259_v10 = vpop.permute.xlu1 %1258 }
 0x929   :  { %v1264_v13 = vmul.f32 %v1259_v10, %v1254_v6 }
 0x92b   :  { %v3528_v14 = vadd.f32 %v1269_v11, %v1264_v13 }
 0x92c   :  { %v1261_v0 = vpop.permute.xlu1 %1260 }
 0x92d   :  { %v1265_v19 = vmul.f32 %v1261_v0, %v1255_v16  ;;  %v1275_v20 = vrot.slane %v3528_v14, 1  ;;  %v1394_v46 = vrot.slane %v3528_v14, 7  ;;  %v2053_v6 = vsel %vm2052_vm7, %v3504_v40, %v3528_v14 }
 0x92f   :  { %v3530_v7 = vadd.f32 %v1270_v63, %v1265_v19 }
 0x931   :  { %v1276_v22 = vsel %vm1149_vm6, %v3530_v7, %v1275_v20  ;;  %v1395_v1 = vrot.slane %v3530_v7, 7  ;;  %v2054_v16 = vsel %vm2052_vm7, %v3501_v32, %v3530_v7 }
 0x932   :  { %1277 = vrot.lane.b32.xlu1 %v1276_v22, %s2995_s4 }
 0x9a4   :  { %v1278_v23 = vpop.permute.xlu1 %1277 }
 0x9a5   :  { %2220 = vmatmul.mubr.msk.f32.vlgmr.msra.gmra.mrb[12].mxu1 %vm353_vm4, %v1278_v23 }
 0x9a6   :  { %2593 = vmatpush1.bf16.msra.mxu1 %v3393_v21  ;;  %1605 = vmatprep.mubr.f32.mxu1 %v2992_v2 }
 0x9a7   :  { %2595 = vmatprep.subr.bf16.mxu1 %v3404_v24 }
 0x9aa   :  { %2597 = vmatpush1.bf16.msra.mxu1 %v3412_v27 }
 0x9ab   :  { %2599 = vmatprep.subr.bf16.mxu1 %v3422_v30 }
 0x9ae   :  { %2601 = vmatpush1.bf16.msra.mxu1 %v3430_v33 }
 0x9af   :  { %2603 = vmatprep.subr.bf16.mxu1 %v3440_v36 }
 0x9b2   :  { %2605 = vmatpush1.bf16.msra.mxu1 %v3448_v39 }
 0x9b3   :  { %2623 = vmatprep.subr.bf16.mxu1 %v3385_v18 }
 0xa78   :  { %v1347_v25 = vpop.f32.mrb[12].mxu1 }
 0xa79   :  { %v1348_v26 = vadd.f32 %v1347_v25, %v3478_v51  ;;  %v1349_v28 = vpop.f32.mrb[13].mxu1 }
 0xa7a   :  { %v1350_v44 = vadd.f32 %v1349_v28, %v3488_v8 }
 0xa7b   :  { %v1353_v29 = vrot.slane %v1348_v26, 6  ;;  %v1354_v31 = vrot.slane %v1348_v26, 7 }
 0xa7c   :  { %v1372_v45 = vrot.slane %v1350_v44, 6  ;;  %v1373_v48 = vrot.slane %v1350_v44, 7 }
 0xa7d   :  { %v1357_v34 = vadd.f32 %v1353_v29, %v3480_v53  ;;  %v1358_v35 = vadd.f32 %v1354_v31, %v3483_v56 }
 0xa7f   :  { %v2221_v37 = vmul.f32 -1.442695, %v1357_v34  ;;  %v2222_v38 = vmul.f32 -1.442695, %v1358_v35 }
 0xa81   :  { %2722 = vpow2.f32 %v2221_v37 }
 0xa82   :  { %2724 = vpow2.f32 %v2222_v38 }
 0xa8b   :  { %v2723_v60 = vpop.eup %2722 }
 0xa8c   :  { %v2725_v41 = vpop.eup %2724  ;;  %v1365_v42 = vadd.f32 1.0, %v2723_v60 }
 0xa8d   :  { %v1366_v43 = vadd.f32 1.0, %v2725_v41 }
 0xa8e   :  { %2726 = vrcp.f32 %v1365_v42 }
 0xa8f   :  { %2728 = vrcp.f32 %v1366_v43 }
 0xa98   :  { %v2727_v47 = vpop.eup %2726 }
 0xa99   :  { %v2729_v49 = vpop.eup %2728  ;;  %v1376_v50 = vmul.f32 %v2727_v47, %v1372_v45  ;;  %v1398_v52 = vmul.f32 %v2727_v47, %v1394_v46  ;;  %v1382_v62 = vsub.f32 1.0, %v2727_v47 }
 0xa9a   :  { %v1377_v54 = vmul.f32 %v2729_v49, %v1373_v48  ;;  %v1399_v55 = vmul.f32 %v2729_v49, %v1395_v1  ;;  %v1383_v5 = vsub.f32 1.0, %v2729_v49 }
 0xa9b   :  { %v1378_v57 = vadd.f32 %v1376_v50, %v3491_v12 }
 0xa9c   :  { %v1379_v58 = vadd.f32 %v1377_v54, %v3493_v17 }
 0xa9d   :  { %2730 = vtanh.f32 %v1378_v57 }
 0xa9e   :  { %2732 = vtanh.f32 %v1379_v58 }
 0xaa7   :  { %v2731_v59 = vpop.eup %2730 }
 0xaa8   :  { %1386 = vrot.lane.b32.xlu1 %v2731_v59, %s2995_s4  ;;  %v2733_v61 = vpop.eup %2732 }
 0xaac   :  { %1388 = vrot.lane.b32.xlu1 %v2733_v61, %s2995_s4 }
 0xb1a   :  { %v1387_v3 = vpop.permute.xlu1 %1386 }
 0xb1b   :  { %v1392_v15 = vmul.f32 %v1387_v3, %v1382_v62 }
 0xb1d   :  { %v1400_v4 = vadd.f32 %v1398_v52, %v1392_v15 }
 0xb1e   :  { %v1389_v9 = vpop.permute.xlu1 %1388 }
 0xb1f   :  { %v3558_v10 = vsel %vm2055_vm8, %v2053_v6, %v1400_v4  ;;  %v1393_v11 = vmul.f32 %v1389_v9, %v1383_v5  ;;  %v1404_v63 = vrot.slane %v1400_v4, 2  ;;  %v1524_v60 = vrot.slane %v1400_v4, 7 }
 0xb21   :  { %v1401_v13 = vadd.f32 %v1399_v55, %v1393_v11 }
 0xb23   :  { %v3562_v0 = vsel %vm2055_vm8, %v2054_v16, %v1401_v13  ;;  %v1405_v19 = vrot.slane %v1401_v13, 1  ;;  %v1525_v43 = vrot.slane %v1401_v13, 7 }
 0xb25   :  { %v1406_v20 = vsel %vm1149_vm6, %v1405_v19, %v1404_v63 }
 0xb26   :  { %1407 = vrot.lane.b32.xlu0 %v1406_v20, %s2995_s4 }
 0xb98   :  { %v1408_v22 = vpop.permute.xlu0 %1407 }
 0xb99   :  { %2223 = vmatmul.mubr.msk.f32.vlgmr.msra.gmra.mrb[10].mxu0 %vm353_vm4, %v1408_v22 }
 0xb9a   :  { %2609 = vmatpush1.bf16.msra.mxu0 %v3393_v21  ;;  %1735 = vmatprep.mubr.f32.mxu0 %v2992_v2 }
 0xb9b   :  { %2611 = vmatprep.subr.bf16.mxu0 %v3404_v24 }
 0xb9e   :  { %2613 = vmatpush1.bf16.msra.mxu0 %v3412_v27 }
 0xb9f   :  { %2615 = vmatprep.subr.bf16.mxu0 %v3422_v30 }
 0xba2   :  { %2617 = vmatpush1.bf16.msra.mxu0 %v3430_v33 }
 0xba3   :  { %2619 = vmatprep.subr.bf16.mxu0 %v3440_v36 }
 0xba6   :  { %2621 = vmatpush1.bf16.msra.mxu0 %v3448_v39 }
 0xba7   :  { %2639 = vmatprep.subr.bf16.mxu0 %v3385_v18 }
 0xc6c   :  { %v1477_v32 = vpop.f32.mrb[10].mxu0 }
 0xc6d   :  { %v1478_v40 = vadd.f32 %v1477_v32, %v3478_v51  ;;  %v1479_v14 = vpop.f32.mrb[11].mxu0 }
 0xc6e   :  { %v1480_v18 = vadd.f32 %v1479_v14, %v3488_v8 }
 0xc6f   :  { %v1483_v7 = vrot.slane %v1478_v40, 5  ;;  %v1484_v23 = vrot.slane %v1478_v40, 6 }
 0xc70   :  { %v1502_v38 = vrot.slane %v1480_v18, 5  ;;  %v1503_v42 = vrot.slane %v1480_v18, 6 }
 0xc71   :  { %v1487_v25 = vadd.f32 %v1483_v7, %v3480_v53  ;;  %v1488_v26 = vadd.f32 %v1484_v23, %v3483_v56 }
 0xc73   :  { %v2224_v28 = vmul.f32 -1.442695, %v1487_v25  ;;  %v2225_v29 = vmul.f32 -1.442695, %v1488_v26 }
 0xc75   :  { %2734 = vpow2.f32 %v2224_v28 }
 0xc76   :  { %2736 = vpow2.f32 %v2225_v29 }
 0xc7f   :  { %v2735_v31 = vpop.eup %2734 }
 0xc80   :  { %v2737_v34 = vpop.eup %2736  ;;  %v1495_v35 = vadd.f32 1.0, %v2735_v31 }
 0xc81   :  { %v1496_v37 = vadd.f32 1.0, %v2737_v34 }
 0xc82   :  { %2738 = vrcp.f32 %v1495_v35 }
 0xc83   :  { %2740 = vrcp.f32 %v1496_v37 }
 0xc8c   :  { %v2739_v41 = vpop.eup %2738 }
 0xc8d   :  { %v2741_v44 = vpop.eup %2740  ;;  %v1506_v45 = vmul.f32 %v2739_v41, %v1502_v38  ;;  %v1528_v46 = vmul.f32 %v2739_v41, %v1524_v60  ;;  %v1512_v54 = vsub.f32 1.0, %v2739_v41 }
 0xc8e   :  { %v1507_v47 = vmul.f32 %v2741_v44, %v1503_v42  ;;  %v1529_v48 = vmul.f32 %v2741_v44, %v1525_v43  ;;  %v1513_v55 = vsub.f32 1.0, %v2741_v44 }
 0xc8f   :  { %v1508_v1 = vadd.f32 %v1506_v45, %v3491_v12 }
 0xc90   :  { %v1509_v49 = vadd.f32 %v1507_v47, %v3493_v17 }
 0xc91   :  { %2742 = vtanh.f32 %v1508_v1 }
 0xc92   :  { %2744 = vtanh.f32 %v1509_v49 }
 0xc9b   :  { %v2743_v50 = vpop.eup %2742 }
 0xc9c   :  { %v2745_v52 = vpop.eup %2744  ;;  %1516 = vrot.lane.b32.xlu1 %v2743_v50, %s2995_s4 }
 0xc9d   :  { %1518 = vrot.lane.b32.xlu0 %v2745_v52, %s2995_s4 }
 0xd0e   :  { %v1517_v57 = vpop.permute.xlu1 %1516 }
 0xd0f   :  { %v1519_v58 = vpop.permute.xlu0 %1518  ;;  %v1522_v59 = vmul.f32 %v1517_v57, %v1512_v54 }
 0xd10   :  { %v1523_v61 = vmul.f32 %v1519_v58, %v1513_v55 }
 0xd11   :  { %v1530_v62 = vadd.f32 %v1528_v46, %v1522_v59 }
 0xd12   :  { %v1531_v3 = vadd.f32 %v1529_v48, %v1523_v61 }
 0xd13   :  { %v2059_v15 = vsel %vm2058_vm9, %v3558_v10, %v1530_v62  ;;  %v1534_v4 = vrot.slane %v1530_v62, 3  ;;  %v1654_v28 = vrot.slane %v1530_v62, 7 }
 0xd14   :  { %v2060_v5 = vsel %vm2058_vm9, %v3562_v0, %v1531_v3  ;;  %v1535_v6 = vrot.slane %v1531_v3, 2  ;;  %v1655_v34 = vrot.slane %v1531_v3, 7 }
 0xd16   :  { %v1536_v9 = vsel %vm1149_vm6, %v1535_v6, %v1534_v4 }
 0xd17   :  { %1537 = vrot.lane.b32.xlu1 %v1536_v9, %s2995_s4 }
 0xd89   :  { %v1538_v11 = vpop.permute.xlu1 %1537 }
 0xd8a   :  { %2226 = vmatmul.mubr.msk.f32.vlgmr.msra.gmra.mrb[14].mxu1 %vm353_vm4, %v1538_v11 }
 0xd8b   :  { %2625 = vmatpush1.bf16.msra.mxu1 %v3393_v21  ;;  %1865 = vmatprep.mubr.f32.mxu1 %v2992_v2 }
 0xd8c   :  { %2627 = vmatprep.subr.bf16.mxu1 %v3404_v24 }
 0xd8f   :  { %2629 = vmatpush1.bf16.msra.mxu1 %v3412_v27 }
 0xd90   :  { %2631 = vmatprep.subr.bf16.mxu1 %v3422_v30 }
 0xd93   :  { %2633 = vmatpush1.bf16.msra.mxu1 %v3430_v33 }
 0xd94   :  { %2635 = vmatprep.subr.bf16.mxu1 %v3440_v36 }
 0xd97   :  { %2637 = vmatpush1.bf16.msra.mxu1 %v3448_v39 }
 0xe5d   :  { %v1607_v10 = vpop.f32.mrb[14].mxu1 }
 0xe5e   :  { %v1608_v13 = vadd.f32 %v1607_v10, %v3478_v51  ;;  %v1609_v16 = vpop.f32.mrb[15].mxu1 }
 0xe5f   :  { %v1610_v25 = vadd.f32 %v1609_v16, %v3488_v8 }
 0xe60   :  { %v1613_v0 = vrot.slane %v1608_v13, 4  ;;  %v1614_v63 = vrot.slane %v1608_v13, 5 }
 0xe61   :  { %v1632_v26 = vrot.slane %v1610_v25, 4  ;;  %v1633_v31 = vrot.slane %v1610_v25, 5 }
 0xe62   :  { %v1617_v19 = vadd.f32 %v1613_v0, %v3480_v53  ;;  %v1618_v20 = vadd.f32 %v1614_v63, %v3483_v56 }
 0xe64   :  { %v2227_v22 = vmul.f32 -1.442695, %v1617_v19  ;;  %v2228_v32 = vmul.f32 -1.442695, %v1618_v20 }
 0xe66   :  { %2746 = vpow2.f32 %v2227_v22 }
 0xe67   :  { %2748 = vpow2.f32 %v2228_v32 }
 0xe70   :  { %v2747_v40 = vpop.eup %2746 }
 0xe71   :  { %v2749_v14 = vpop.eup %2748  ;;  %v1625_v7 = vadd.f32 1.0, %v2747_v40 }
 0xe72   :  { %v1626_v23 = vadd.f32 1.0, %v2749_v14 }
 0xe73   :  { %2750 = vrcp.f32 %v1625_v7 }
 0xe74   :  { %2752 = vrcp.f32 %v1626_v23 }
 0xe7d   :  { %v2751_v29 = vpop.eup %2750 }
 0xe7e   :  { %v2753_v35 = vpop.eup %2752  ;;  %v1636_v37 = vmul.f32 %v2751_v29, %v1632_v26  ;;  %v1658_v18 = vmul.f32 %v2751_v29, %v1654_v28  ;;  %v1642_v45 = vsub.f32 1.0, %v2751_v29 }
 0xe7f   :  { %v1637_v38 = vmul.f32 %v2753_v35, %v1633_v31  ;;  %v1659_v60 = vmul.f32 %v2753_v35, %v1655_v34  ;;  %v1643_v46 = vsub.f32 1.0, %v2753_v35 }
 0xe80   :  { %v1638_v41 = vadd.f32 %v1636_v37, %v3491_v12 }
 0xe81   :  { %v1639_v42 = vadd.f32 %v1637_v38, %v3493_v17 }
 0xe82   :  { %2754 = vtanh.f32 %v1638_v41 }
 0xe83   :  { %2756 = vtanh.f32 %v1639_v42 }
 0xe8c   :  { %v2755_v43 = vpop.eup %2754 }
 0xe8d   :  { %v2757_v44 = vpop.eup %2756  ;;  %1646 = vrot.lane.b32.xlu0 %v2755_v43, %s2995_s4 }
 0xe8e   :  { %1648 = vrot.lane.b32.xlu1 %v2757_v44, %s2995_s4 }
 0xeff   :  { %v1647_v47 = vpop.permute.xlu0 %1646 }
 0xf00   :  { %v1649_v48 = vpop.permute.xlu1 %1648  ;;  %v1652_v1 = vmul.f32 %v1647_v47, %v1642_v45 }
 0xf01   :  { %v1653_v49 = vmul.f32 %v1649_v48, %v1643_v46 }
 0xf02   :  { %v1660_v50 = vadd.f32 %v1658_v18, %v1652_v1 }
 0xf03   :  { %v1661_v52 = vadd.f32 %v1659_v60, %v1653_v49 }
 0xf04   :  { %v3605_v54 = vsel %vm2061_vm10, %v2059_v15, %v1660_v50  ;;  %v1664_v55 = vrot.slane %v1660_v50, 4  ;;  %v1784_v11 = vrot.slane %v1660_v50, 7 }
 0xf05   :  { %v3607_v57 = vsel %vm2061_vm10, %v2060_v5, %v1661_v52  ;;  %v1665_v58 = vrot.slane %v1661_v52, 3  ;;  %v1785_v16 = vrot.slane %v1661_v52, 7 }
 0xf07   :  { %v1666_v59 = vsel %vm1149_vm6, %v1665_v58, %v1664_v55 }
 0xf08   :  { %1667 = vrot.lane.b32.xlu0 %v1666_v59, %s2995_s4 }
 0xf7a   :  { %v1668_v61 = vpop.permute.xlu0 %1667 }
 0xf7b   :  { %2229 = vmatmul.mubr.msk.f32.vlgmr.msra.gmra.mrb[12].mxu0 %vm353_vm4, %v1668_v61 }
 0xf7c   :  { %2641 = vmatpush1.bf16.msra.mxu0 %v3393_v21  ;;  %1995 = vmatprep.mubr.f32.mxu0 %v2992_v2 }
 0xf7d   :  { %2643 = vmatprep.subr.bf16.mxu0 %v3404_v24 }
 0xf80   :  { %2645 = vmatpush1.bf16.msra.mxu0 %v3412_v27 }
 0xf81   :  { %2647 = vmatprep.subr.bf16.mxu0 %v3422_v30 }
 0xf84   :  { %2649 = vmatpush1.bf16.msra.mxu0 %v3430_v33 }
 0xf85   :  { %2651 = vmatprep.subr.bf16.mxu0 %v3440_v36 }
 0xf88   :  { %2653 = vmatpush1.bf16.msra.mxu0 %v3448_v39 }
0x104e   :  { %v1737_v62 = vpop.f32.mrb[12].mxu0 }
0x104f   :  { %v1738_v3 = vadd.f32 %v1737_v62, %v3478_v51  ;;  %v1739_v15 = vpop.f32.mrb[13].mxu0 }
0x1050   :  { %v1740_v39 = vadd.f32 %v1739_v15, %v3488_v8 }
0x1051   :  { %v1743_v4 = vrot.slane %v1738_v3, 3  ;;  %v1744_v21 = vrot.slane %v1738_v3, 4 }
0x1052   :  { %v1762_v9 = vrot.slane %v1740_v39, 3  ;;  %v1763_v13 = vrot.slane %v1740_v39, 4 }
0x1053   :  { %v1747_v2 = vadd.f32 %v1743_v4, %v3480_v53  ;;  %v1748_v24 = vadd.f32 %v1744_v21, %v3483_v56 }
0x1055   :  { %v2230_v5 = vmul.f32 -1.442695, %v1747_v2  ;;  %v2231_v27 = vmul.f32 -1.442695, %v1748_v24 }
0x1057   :  { %2758 = vpow2.f32 %v2230_v5 }
0x1058   :  { %2760 = vpow2.f32 %v2231_v27 }
0x1061   :  { %v2759_v30 = vpop.eup %2758 }
0x1062   :  { %v2761_v33 = vpop.eup %2760  ;;  %v1755_v6 = vadd.f32 1.0, %v2759_v30 }
0x1063   :  { %v1756_v36 = vadd.f32 1.0, %v2761_v33 }
0x1064   :  { %2762 = vrcp.f32 %v1755_v6 }
0x1065   :  { %2764 = vrcp.f32 %v1756_v36 }
0x106e   :  { %v2763_v10 = vpop.eup %2762 }
0x106f   :  { %v2765_v0 = vpop.eup %2764  ;;  %v1766_v63 = vmul.f32 %v2763_v10, %v1762_v9  ;;  %v1788_v19 = vmul.f32 %v2763_v10, %v1784_v11  ;;  %v1772_v23 = vsub.f32 1.0, %v2763_v10 }
0x1070   :  { %v1767_v20 = vmul.f32 %v2765_v0, %v1763_v13  ;;  %v1789_v22 = vmul.f32 %v2765_v0, %v1785_v16  ;;  %v1773_v25 = vsub.f32 1.0, %v2765_v0 }
0x1071   :  { %v1768_v32 = vadd.f32 %v1766_v63, %v3491_v12 }
0x1072   :  { %v1769_v40 = vadd.f32 %v1767_v20, %v3493_v17 }
0x1073   :  { %2766 = vtanh.f32 %v1768_v32 }
0x1074   :  { %2768 = vtanh.f32 %v1769_v40 }
0x107d   :  { %v2767_v14 = vpop.eup %2766 }
0x107e   :  { %v2769_v7 = vpop.eup %2768  ;;  %1776 = vrot.lane.b32.xlu1 %v2767_v14, %s2995_s4 }
0x107f   :  { %1778 = vrot.lane.b32.xlu0 %v2769_v7, %s2995_s4 }
0x10f0   :  { %v1777_v26 = vpop.permute.xlu1 %1776 }
0x10f1   :  { %v1779_v28 = vpop.permute.xlu0 %1778  ;;  %v1782_v29 = vmul.f32 %v1777_v26, %v1772_v23 }
0x10f2   :  { %v1783_v31 = vmul.f32 %v1779_v28, %v1773_v25 }
0x10f3   :  { %v1790_v34 = vadd.f32 %v1788_v19, %v1782_v29 }
0x10f4   :  { %v1791_v35 = vadd.f32 %v1789_v22, %v1783_v31 }
0x10f5   :  { %v1794_v37 = vrot.slane %v1790_v34, 5  ;;  %v2065_v18 = vsel %vm2064_vm11, %v3605_v54, %v1790_v34  ;;  %v1914_v61 = vrot.slane %v1790_v34, 7 }
0x10f6   :  { %v1795_v38 = vrot.slane %v1791_v35, 4  ;;  %v2066_v60 = vsel %vm2064_vm11, %v3607_v57, %v1791_v35  ;;  %v1915_v15 = vrot.slane %v1791_v35, 7 }
0x10f8   :  { %v1796_v41 = vsel %vm1149_vm6, %v1795_v38, %v1794_v37 }
0x10f9   :  { %1797 = vrot.lane.b32.xlu1 %v1796_v41, %s2995_s4 }
0x116b   :  { %v1798_v42 = vpop.permute.xlu1 %1797 }
0x116c   :  { %2232 = vmatmul.mubr.msk.f32.vlgmr.msra.gmra.mrb[16].mxu1 %vm353_vm4, %v1798_v42 }
0x123f   :  { %v1867_v43 = vpop.f32.mrb[16].mxu1 }
0x1240   :  { %v1868_v44 = vadd.f32 %v1867_v43, %v3478_v51  ;;  %v1869_v45 = vpop.f32.mrb[17].mxu1 }
0x1241   :  { %v1870_v58 = vadd.f32 %v1869_v45, %v3488_v8 }
0x1242   :  { %v1873_v46 = vrot.slane %v1868_v44, 2  ;;  %v1874_v47 = vrot.slane %v1868_v44, 3 }
0x1243   :  { %v1892_v59 = vrot.slane %v1870_v58, 2  ;;  %v1893_v3 = vrot.slane %v1870_v58, 3 }
0x1244   :  { %v1877_v48 = vadd.f32 %v1873_v46, %v3480_v53  ;;  %v1878_v1 = vadd.f32 %v1874_v47, %v3483_v56 }
0x1246   :  { %v2233_v49 = vmul.f32 -1.442695, %v1877_v48  ;;  %v2234_v50 = vmul.f32 -1.442695, %v1878_v1 }
0x1248   :  { %2770 = vpow2.f32 %v2233_v49  ;;  %v2074_v49 = vld [vmem:[%s3717_s16 + $0x8] sm:$0xff] }
0x1249   :  { %2772 = vpow2.f32 %v2234_v50  ;;  %v2075_v50 = vld [vmem:[%s3717_s16 + $0x10] sm:$0xff] }
0x1252   :  { %v2771_v52 = vpop.eup %2770 }
0x1253   :  { %v2773_v54 = vpop.eup %2772  ;;  %v1885_v55 = vadd.f32 1.0, %v2771_v52 }
0x1254   :  { %v1886_v57 = vadd.f32 1.0, %v2773_v54  ;;  %v2077_v54 = vld [vmem:[%s3717_s16 + $0x20] sm:$0xff] }
0x1255   :  { %2774 = vrcp.f32 %v1885_v55  ;;  %v2078_v55 = vld [vmem:[%s3717_s16 + $0x28] sm:$0xff] }
0x1256   :  { %2776 = vrcp.f32 %v1886_v57  ;;  %v2662_v57 = vpack.c.bf16 %v2078_v55, %v2077_v54 }
0x125f   :  { %v2775_v62 = vpop.eup %2774 }
0x1260   :  { %v2777_v4 = vpop.eup %2776  ;;  %v1896_v21 = vmul.f32 %v2775_v62, %v1892_v59  ;;  %v1918_v2 = vmul.f32 %v2775_v62, %v1914_v61  ;;  %v1902_v36 = vsub.f32 1.0, %v2775_v62  ;;  %v2079_v59 = vld [vmem:[%s3717_s16 + $0x30] sm:$0xff]  ;;  %v2080_v61 = vld [vmem:[%s3717_s16 + $0x38] sm:$0xff] }
0x1261   :  { %v1897_v24 = vmul.f32 %v2777_v4, %v1893_v3  ;;  %v1919_v5 = vmul.f32 %v2777_v4, %v1915_v15  ;;  %v1903_v39 = vsub.f32 1.0, %v2777_v4  ;;  %v2666_v3 = vpack.c.bf16 %v2080_v61, %v2079_v59 }
0x1262   :  { %v1898_v27 = vadd.f32 %v1896_v21, %v3491_v12 }
0x1263   :  { %v1899_v30 = vadd.f32 %v1897_v24, %v3493_v17 }
0x1264   :  { %2778 = vtanh.f32 %v1898_v27 }
0x1265   :  { %2780 = vtanh.f32 %v1899_v30 }
0x126e   :  { %v2779_v33 = vpop.eup %2778 }
0x126f   :  { %v2781_v6 = vpop.eup %2780  ;;  %1906 = vrot.lane.b32.xlu0 %v2779_v33, %s2995_s4 }
0x1270   :  { %1908 = vrot.lane.b32.xlu1 %v2781_v6, %s2995_s4 }
0x12e1   :  { %v1907_v9 = vpop.permute.xlu0 %1906 }
0x12e2   :  { %v1909_v11 = vpop.permute.xlu1 %1908  ;;  %v1912_v10 = vmul.f32 %v1907_v9, %v1902_v36  ;;  %v2238_v9 = vld [vmem:[#allocation13] ss:$0 sm:$0xff] }
0x12e3   :  { %v1913_v13 = vmul.f32 %v1909_v11, %v1903_v39 }
0x12e4   :  { %v1920_v16 = vadd.f32 %v1918_v2, %v1912_v10 }
0x12e5   :  { %v1921_v0 = vadd.f32 %v1919_v5, %v1913_v13 }
0x12e6   :  { %v1924_v63 = vrot.slane %v1920_v16, 6  ;;  %v3641_v19 = vsel %vm2067_vm12, %v2065_v18, %v1920_v16  ;;  %v2044_v41 = vrot.slane %v1920_v16, 7 }
0x12e7   :  { %v1925_v20 = vrot.slane %v1921_v0, 5  ;;  %v3643_v22 = vsel %vm2067_vm12, %v2066_v60, %v1921_v0  ;;  %v2045_v44 = vrot.slane %v1921_v0, 7 }
0x12e9   :  { %v1926_v32 = vsel %vm1149_vm6, %v1925_v20, %v1924_v63 }
0x12ea   :  { %1927 = vrot.lane.b32.xlu0 %v1926_v32, %s2995_s4 }
0x135c   :  { %v1928_v40 = vpop.permute.xlu0 %1927 }
0x135d   :  { %2235 = vmatmul.mubr.msk.f32.vlgmr.msra.gmra.mrb[14].mxu0 %vm353_vm4, %v1928_v40 }
0x1430   :  { %v1997_v14 = vpop.f32.mrb[14].mxu0 }
0x1431   :  { %v1998_v7 = vadd.f32 %v1997_v14, %v3478_v51  ;;  %v1999_v23 = vpop.f32.mrb[15].mxu0 }
0x1432   :  { %v2000_v60 = vadd.f32 %v1999_v23, %v3488_v8  ;;  %v2073_v8 = vld [vmem:[%s3717_s16] sm:$0xff] }
0x1433   :  { %v2003_v25 = vrot.slane %v1998_v7, 1  ;;  %v2004_v26 = vrot.slane %v1998_v7, 2  ;;  %v2654_v52 = vpack.c.bf16 %v2074_v49, %v2073_v8 }
0x1434   :  { %v2022_v51 = vrot.slane %v2000_v60, 1  ;;  %v2023_v43 = vrot.slane %v2000_v60, 2 }
0x1435   :  { %v2007_v28 = vadd.f32 %v2003_v25, %v3480_v53  ;;  %v2008_v29 = vadd.f32 %v2004_v26, %v3483_v56  ;;  %2655 = vmatprep.subr.bf16.mxu1 %v2654_v52 }
0x1436   :  { %2657 = vmatpush3.bf16.msra.mxu1 %v2654_v52 }
0x1437   :  { %v2236_v31 = vmul.f32 -1.442695, %v2007_v28  ;;  %v2237_v34 = vmul.f32 -1.442695, %v2008_v29 }
0x1439   :  { %2782 = vpow2.f32 %v2236_v31 }
0x143a   :  { %2784 = vpow2.f32 %v2237_v34 }
0x1443   :  { %v2783_v35 = vpop.eup %2782 }
0x1444   :  { %v2785_v37 = vpop.eup %2784  ;;  %v2015_v18 = vadd.f32 1.0, %v2783_v35 }
0x1445   :  { %v2016_v38 = vadd.f32 1.0, %v2785_v37 }
0x1446   :  { %2786 = vrcp.f32 %v2015_v18 }
0x1447   :  { %2788 = vrcp.f32 %v2016_v38 }
0x1450   :  { %v2787_v42 = vpop.eup %2786 }
0x1451   :  { %v2789_v53 = vpop.eup %2788  ;;  %v2026_v45 = vmul.f32 %v2787_v42, %v2022_v51  ;;  %v2048_v56 = vmul.f32 %v2787_v42, %v2044_v41  ;;  %v2032_v15 = vsub.f32 1.0, %v2787_v42 }
0x1452   :  { %v2027_v46 = vmul.f32 %v2789_v53, %v2023_v43  ;;  %v2049_v47 = vmul.f32 %v2789_v53, %v2045_v44  ;;  %v2033_v4 = vsub.f32 1.0, %v2789_v53 }
0x1453   :  { %v2028_v48 = vadd.f32 %v2026_v45, %v3491_v12  ;;  %v2076_v12 = vld [vmem:[%s3717_s16 + $0x18] sm:$0xff]  ;;  %s2996_s16 = smov [#allocation14]  }
0x1454   :  { %v2029_v1 = vadd.f32 %v2027_v46, %v3493_v17  ;;  %v2658_v17 = vpack.c.bf16 %v2076_v12, %v2075_v50  ;;  %s2180_s6 = sshll.u32 %s2996_s16, 4  ;;  %s2181_s6 = int_to_ptr.vmem [resolvable:$true] %s2180_s6 }
0x1455   :  { %2790 = vtanh.f32 %v2028_v48  ;;  %s2948_s28 = scalar_lea.vmem %s2181_s6, 256  ;;  %p2953_p1 = scmp.lt.s32.totalorder %s2181_s6, %s2181_s6 }
0x1456   :  { %2792 = vtanh.f32 %v2029_v1  ;;  %2659 = vmatprep.subr.bf16.mxu1 %v2658_v17  ;;  %p2949_p0 = scmp.ne.s32.totalorder %s2181_s6, %s2948_s28  ;;  %p2954_p2 = scmp.lt.s32.totalorder %s2948_s28, %s2948_s28 }
0x1457   :  { %2661 = vmatpush3.bf16.msra.mxu1 %v2658_v17 }
0x1458   :  { %2663 = vmatprep.subr.bf16.mxu1 %v2662_v57  ;;  %p2955_p3 = por %p2954_p2, %p2953_p1 }
0x145a   :  { %p2956_p4 = pnand %p2955_p3, %p2949_p0 }
0x145b   :  { %2665 = vmatpush3.bf16.msra.mxu1 %v2662_v57 }
0x145c   :  { %2667 = vmatprep.subr.bf16.mxu1 %v2666_v3 }
0x145f   :  { %v2791_v58 = vpop.eup %2790  ;;  %2669 = vmatpush3.bf16.msra.mxu1 %v2666_v3 }
0x1460   :  { %v2793_v62 = vpop.eup %2792  ;;  %2036 = vrot.lane.b32.xlu1 %v2791_v58, %s2995_s4 }
0x1461   :  { %2038 = vrot.lane.b32.xlu0 %v2793_v62, %s2995_s4 }
0x14d2   :  { %v2037_v21 = vpop.permute.xlu1 %2036 }
0x14d3   :  { %v2039_v2 = vpop.permute.xlu0 %2038  ;;  %v2042_v24 = vmul.f32 %v2037_v21, %v2032_v15 }
0x14d4   :  { %v2043_v5 = vmul.f32 %v2039_v2, %v2033_v4 }
0x14d5   :  { %v2050_v27 = vadd.f32 %v2048_v56, %v2042_v24 }
0x14d6   :  { %v2051_v30 = vadd.f32 %v2049_v47, %v2043_v5 }
0x14d7   :  { %v2071_v33 = vsel %vm2070_vm13, %v3641_v19, %v2050_v27 }
0x14d8   :  { %v2072_v6 = vsel %vm2070_vm13, %v3643_v22, %v2051_v30  ;;  %2090 = vrot.lane.b32.xlu1 %v2071_v33, %s2995_s4 }
0x14d9   :  { %2092 = vrot.lane.b32.xlu0 %v2072_v6, %s2995_s4 }
0x154a   :  { %v2091_v36 = vpop.permute.xlu1 %2090 }
0x154b   :  { %v2093_v39 = vpop.permute.xlu0 %2092  ;;  %2435 = vmatprep.mubr.msk.f32.mxu1 %vm353_vm4, %v2091_v36 }
0x154c   :  { %2436 = vmatmul.mubr.msk.f32.vlgmr.msra.gmra.mrb[18].mxu1 %vm353_vm4, %v2093_v39 }
0x161f   :  { %v2437_v11 = vpop.f32.mrb[18].mxu1 }
0x1620   :  { %v2170_v10 = vadd.f32 %v2437_v11, %v2238_v9  ;;  %v2164_v13 = vpop.f32.mrb[19].mxu1 }
0x1621   :  { %v2165_v16 = vadd.f32 %v2238_v9, %v2164_v13 }
0x1622   :  { %2174 = vst [vmem:[#allocation14 + $0x8] sm:$0xff] %v2170_v10 }
0x1623   :  { %2173 = vst [vmem:[#allocation14] sm:$0xff] %v2165_v16 }
0x1624   :  { %2959 = shalt.err (!%p2956_p4)
}
0x1625   :  { %s3730_s24 = sld [smem:[#allocation23_spill]] }
0x162b   :  { %s2960_s25 = scalar_lea.hbm %s3730_s24, 256 }
0x162c   :  { %p2961_p5 = scmp.ne.s32.totalorder %s3730_s24, %s2960_s25  ;;  %p2964_p6 = scmp.lt.u32.totalorder %s2960_s25, %s3730_s24 }
0x162e   :  { %p2966_p7 = pnand %p2964_p6, %p2961_p5 }
0x1630   :  { %2969 = shalt.err (!%p2966_p7)
}
0x1631   :  { %2186 = dma.vmem_to_hbm [thread:$0]  %s2181_s6, 256, %s3730_s24, [#allocation4], %s2981_s2, %s2981_s2, %s2982_s23  }
0x1632   :  { %2978 = dma.done.wait [#allocation4], 256  }
0x1633   :  { %2979 = vsyncadd [#allocation4], 4294967040 }
0x1634   :  { %2190 = vsyncpa [#allocation3], 1 }
0x1635   :  { %2191 = vsyncpa [#allocation6], 1 }
0x1636   :  { %2192 = vsyncpa [#allocation9], 1 }
0x1637   :  { %2193 = vsyncpa [#allocation12], 1 }
0x1638   :  { %2194 = vsyncpa [#allocation4], 1 }

</bundles_post_ra>
